<compile_context>
chip_gen: v7x
topology: tpu7x:2x2x1
jax: 0.10.0
libtpu: 0.0.40
codegen_flags: <defaults>
</compile_context>

<pallas_src>
import numpy as np
import jax
import jax.numpy as jnp
from jax import lax
from jax.experimental import pallas as pl
from jax.experimental.pallas import tpu as pltpu

B, C, H, W = 2, 4, 16, 16          # batch, coils, spatial
CW = C * W
GAMMA = 1.5
ALPHA = 0.05
X_SIGMA = 5.0                      # config['method']['bcpnp']['warmup']['x_sigma']
SIGMA = X_SIGMA / 255.0
CIN, COUT, K = 3, 2, 3             # denoiser conv: 3 -> 2 channels, 3x3


def image_update_kernel(w_ref,      # (54,) f32   conv weights (SMEM, scalar prefetch)
                        cm_ref,     # (2,32,32)  bf16  complex-embedded centered DFT / IDFT
                        bd_ref,     # (4,64,64)  bf16  kron(I_C, M^T) real/imag, fwd & inv
                        ssum_ref,   # (64,16)    bf16  coil-sum matrix
                        sh_ref,     # (4,16,16)  bf16  conv shift matrices
                        bias_ref,   # (2,16,16)  f32   conv bias + sigma-channel map
                        dat_ref,    # (1,7,16,64) f32  per-batch data planes
                        out_ref):   # (1,2,16,16) f32  [real, imag] of x_hat
    f32 = jnp.float32
    bf16 = jnp.bfloat16

    xr_w = dat_ref[0, 0]   # x real, tiled per coil        (16, 64)
    xi_w = dat_ref[0, 1]   # x imag, tiled per coil
    sr = dat_ref[0, 2]     # smps real (coil-column layout)
    si = dat_ref[0, 3]     # smps imag
    msk = dat_ref[0, 4]    # mask, tiled per coil
    ymr = dat_ref[0, 5]    # (y * mask) real
    ymi = dat_ref[0, 6]    # (y * mask) imag

    # ---- z = x * smps (complex elementwise, all coils at once) ----
    zr = xr_w * sr - xi_w * si
    zi = xr_w * si + xi_w * sr

    # ---- forward centered FFT2 per coil:  F = M @ Z @ M^T ----
    zs = jnp.concatenate([zr, zi], axis=0).astype(bf16)               # (32,64)
    us = jnp.dot(cm_ref[0], zs, preferred_element_type=f32)           # [Ur; Ui]
    us_b = us.astype(bf16)
    pa = jnp.dot(us_b, bd_ref[0], preferred_element_type=f32)         # @ Re(M^T) blocks
    pb = jnp.dot(us_b, bd_ref[1], preferred_element_type=f32)         # @ Im(M^T) blocks
    fr = pa[:16] - pb[16:]
    fi = pb[:16] + pa[16:]

    # ---- k-space residual: (mask*F - y)*mask == mask*F - y*mask (mask is 0/1) ----
    rr = msk * fr - ymr
    ri = msk * fi - ymi

    # ---- inverse centered FFT2 ----
    rs = jnp.concatenate([rr, ri], axis=0).astype(bf16)
    gs = jnp.dot(cm_ref[1], rs, preferred_element_type=f32)
    gs_b = gs.astype(bf16)
    qa = jnp.dot(gs_b, bd_ref[2], preferred_element_type=f32)
    qb = jnp.dot(gs_b, bd_ref[3], preferred_element_type=f32)
    hr = qa[:16] - qb[16:]
    hi = qb[:16] + qa[16:]

    # ---- * conj(smps), coil-sum via one (32,64)@(64,16) matmul ----
    ar = hr * sr + hi * si
    ai = hi * sr - hr * si
    accs = jnp.dot(jnp.concatenate([ar, ai], axis=0).astype(bf16), ssum_ref[...],
                   preferred_element_type=f32)                        # (32,16)
    accr = accs[:16]
    acci = accs[16:]

    # ---- data-consistency step ----
    xr0 = xr_w[:, :W]           # first coil block == untiled x
    xi0 = xi_w[:, :W]
    xnr = xr0 - GAMMA * accr
    xni = xi0 - GAMMA * acci

    # ---- denoiser: 3x3 conv over [Re(xn), Im(xn)] ----
    # sigma channel + bias are folded into bias_ref (host precomputed).
    # Shifted planes are produced with batched bf16 shift-matrix matmuls and
    # accumulated immediately (no big set of live planes).
    xnr_b = xnr.astype(bf16)
    xni_b = xni.astype(bf16)
    acc0 = bias_ref[0]
    acc1 = bias_ref[1]
    for dy in (-1, 0, 1):
        ky = dy + 1
        if dy == 0:
            pr_, pi_ = xnr, xni
        else:
            rmat = sh_ref[0] if dy == -1 else sh_ref[1]
            pr_ = jnp.dot(rmat, xnr_b, preferred_element_type=f32)
            pi_ = jnp.dot(rmat, xni_b, preferred_element_type=f32)
        st_b = jnp.concatenate([pr_, pi_], axis=0).astype(bf16)       # (32,16)
        for dx in (-1, 0, 1):
            kx = dx + 1
            if dx == 0:
                qr, qi = pr_, pi_
            else:
                cmat = sh_ref[2] if dx == -1 else sh_ref[3]
                cp = jnp.dot(st_b, cmat, preferred_element_type=f32)  # (32,16)
                qr = cp[:16]
                qi = cp[16:]
            w0r = w_ref[(0 * CIN + 0) * (K * K) + ky * K + kx]
            w0i = w_ref[(0 * CIN + 1) * (K * K) + ky * K + kx]
            w1r = w_ref[(1 * CIN + 0) * (K * K) + ky * K + kx]
            w1i = w_ref[(1 * CIN + 1) * (K * K) + ky * K + kx]
            acc0 = acc0 + w0r * qr + w0i * qi
            acc1 = acc1 + w1r * qr + w1i * qi

    # ---- x_hat = alpha * prior + (1 - alpha) * xn ----
    out_ref[0, 0] = ALPHA * acc0 + (1.0 - ALPHA) * xnr
    out_ref[0, 1] = ALPHA * acc1 + (1.0 - ALPHA) * xni


# ------------------------------ host-side glue ------------------------------

def _centered_dft(n):
    eye = np.eye(n)
    fwd = np.fft.fftshift(np.fft.fft(np.fft.ifftshift(eye, axes=0),
                                     axis=0, norm='ortho'), axes=0)
    inv = np.fft.fftshift(np.fft.ifft(np.fft.ifftshift(eye, axes=0),
                                      axis=0, norm='ortho'), axes=0)
    return fwd, inv


def _cplx_embed(m):
    return np.block([[m.real, -m.imag], [m.imag, m.real]])


def _shift_matrix(d, n):
    m = np.zeros((n, n), np.float64)
    for i in range(n):
        j = i + d
        if 0 <= j < n:
            m[i, j] = 1.0
    return m


def _coil_cols(a):            # (B, C, H, W) -> (B, H, C*W)
    return jnp.transpose(a, (0, 2, 1, 3)).reshape(B, H, CW)


def image_update(x, smps, mask, y, w, b):
    f32 = jnp.float32
    mask = mask.astype(f32)
    ym = y * mask[:, None]                         # hoisted y*mask (mask^2 == mask)

    xr_w = jnp.tile(jnp.real(x).astype(f32), (1, 1, C))
    xi_w = jnp.tile(jnp.imag(x).astype(f32), (1, 1, C))
    m_w = jnp.tile(mask, (1, 1, C))
    sr_w = _coil_cols(jnp.real(smps).astype(f32))
    si_w = _coil_cols(jnp.imag(smps).astype(f32))
    ymr_w = _coil_cols(jnp.real(ym).astype(f32))
    ymi_w = _coil_cols(jnp.imag(ym).astype(f32))
    dat = jnp.stack([xr_w, xi_w, sr_w, si_w, m_w, ymr_w, ymi_w], axis=1)  # (B,7,H,CW)

    # Constant matrices (bf16 MXU operands).
    fwd, inv = _centered_dft(H)
    cm = np.stack([_cplx_embed(fwd), _cplx_embed(inv)])                       # (2,32,32)
    eye_c = np.eye(C)
    bd = np.stack([np.kron(eye_c, fwd.T.real), np.kron(eye_c, fwd.T.imag),
                   np.kron(eye_c, inv.T.real), np.kron(eye_c, inv.T.imag)])   # (4,64,64)
    ssum = np.kron(np.ones((C, 1)), np.eye(W))                                # (64,16)
    sh = np.stack([_shift_matrix(-1, H), _shift_matrix(1, H),
                   _shift_matrix(-1, W).T, _shift_matrix(1, W).T])            # (4,16,16)

    cm = jnp.asarray(cm, dtype=jnp.bfloat16)
    bd = jnp.asarray(bd, dtype=jnp.bfloat16)
    ssum = jnp.asarray(ssum, dtype=jnp.bfloat16)
    sh = jnp.asarray(sh, dtype=jnp.bfloat16)

    # sigma channel is a constant plane: its conv contribution is data
    # independent, so fold it (plus the bias) into a per-channel bias map.
    w = w.astype(f32)
    b = b.astype(f32)
    sig_in = jnp.full((1, 1, H, W), SIGMA, f32)
    bias_map = lax.conv_general_dilated(
        sig_in, w[:, 2:3], (1, 1), 'SAME',
        dimension_numbers=('NCHW', 'OIHW', 'NCHW'))[0] + b[:, None, None]     # (2,H,W)

    w_flat = w.reshape(-1)                                                    # (54,)

    out = pl.pallas_call(
        image_update_kernel,
        out_shape=jax.ShapeDtypeStruct((B, 2, H, W), f32),
        grid_spec=pltpu.PrefetchScalarGridSpec(
            num_scalar_prefetch=1,                 # conv weights -> SMEM
            grid=(B,),
            in_specs=[
                pl.BlockSpec((2, 32, 32), lambda i, *_: (0, 0, 0)),     # cm
                pl.BlockSpec((4, 64, 64), lambda i, *_: (0, 0, 0)),     # bd
                pl.BlockSpec((CW, W), lambda i, *_: (0, 0)),            # ssum
                pl.BlockSpec((4, H, W), lambda i, *_: (0, 0, 0)),       # shift mats
                pl.BlockSpec((2, H, W), lambda i, *_: (0, 0, 0)),       # bias map
                pl.BlockSpec((1, 7, H, CW), lambda i, *_: (i, 0, 0, 0)),  # per-batch data
            ],
            out_specs=pl.BlockSpec((1, 2, H, W), lambda i, *_: (i, 0, 0, 0)),
        ),
        compiler_params=pltpu.CompilerParams(dimension_semantics=("parallel",)),
    )(w_flat, cm, bd, ssum, sh, bias_map, dat)
    return out[:, 0] + 1j * out[:, 1]


# ------------------------------ pure-JAX reference ------------------------------

def reference(x, smps, mask, y, w, b):
    def fmult(x, smps, mask):
        z = x[:, None] * smps
        z = jnp.fft.ifftshift(z, axes=(-2, -1))
        z = jnp.fft.fft2(z, norm='ortho')
        z = jnp.fft.fftshift(z, axes=(-2, -1))
        return z * mask[:, None]

    def ftran(yy, smps, mask):
        yy = yy * mask[:, None]
        yy = jnp.fft.ifftshift(yy, axes=(-2, -1))
        xx = jnp.fft.ifft2(yy, norm='ortho')
        xx = jnp.fft.fftshift(xx, axes=(-2, -1))
        return (xx * jnp.conj(smps)).sum(1)

    dc = ftran(fmult(x, smps, mask) - y, smps, mask)
    xn = x - GAMMA * dc
    inp = jnp.stack([xn.real, xn.imag,
                     jnp.full(xn.real.shape, SIGMA, jnp.float32)], axis=1)
    conv = lax.conv_general_dilated(inp, w, (1, 1), 'SAME',
                                    dimension_numbers=('NCHW', 'OIHW', 'NCHW'))
    conv = conv + b[None, :, None, None]
    prior = conv[:, 0] + 1j * conv[:, 1]
    return ALPHA * prior + (1.0 - ALPHA) * xn


if __name__ == "__main__":
    key = jax.random.PRNGKey(0)
    ks = jax.random.split(key, 8)
    x = (jax.random.normal(ks[0], (B, H, W))
         + 1j * jax.random.normal(ks[1], (B, H, W))).astype(jnp.complex64)
    smps = 0.5 * (jax.random.normal(ks[2], (B, C, H, W))
                  + 1j * jax.random.normal(ks[3], (B, C, H, W))).astype(jnp.complex64)
    mask = (jax.random.uniform(ks[4], (B, H, W)) > 0.5).astype(jnp.float32)
    y = (jax.random.normal(ks[5], (B, C, H, W))
         + 1j * jax.random.normal(ks[6], (B, C, H, W))).astype(jnp.complex64)

    # deterministic synthetic denoiser parameters (net_x ~ Conv2d(3, 2, 3, padding=1))
    w = (0.1 * jax.random.normal(jax.random.PRNGKey(1), (COUT, CIN, K, K))).astype(jnp.float32)
    b = jnp.array([0.01, -0.02], jnp.float32)

    out = image_update(x, smps, mask, y, w, b)
    out = jax.block_until_ready(out)

    ref = reference(x, smps, mask, y, w, b)
    # bf16 MXU operands (per the performance review) carry ~1e-2-level worst-case
    # absolute error on O(1..10) data, so the tolerance is widened from the pure
    # f32 version's 2e-2.  Elementwise math and all accumulation remain f32.
    np.testing.assert_allclose(np.asarray(out), np.asarray(ref), rtol=5e-2, atol=5e-2)
    print("KERNEL_OK")
</pallas_src>

<mosaic_0001>
module attributes {stable_mosaic.version = 11 : i64} {
  func.func @image_update_kernel(%arg0: i32, %arg1: memref<54xf32, #tpu.memory_space<smem>>, %arg2: memref<2x32x32xbf16, #tpu.memory_space<vmem>>, %arg3: memref<4x64x64xbf16, #tpu.memory_space<vmem>>, %arg4: memref<64x16xbf16, #tpu.memory_space<vmem>>, %arg5: memref<4x16x16xbf16, #tpu.memory_space<vmem>>, %arg6: memref<2x16x16xf32, #tpu.memory_space<vmem>>, %arg7: memref<1x7x16x64xf32, #tpu.memory_space<vmem>>, %arg8: memref<1x2x16x16xf32, #tpu.memory_space<vmem>>) attributes {dimension_semantics = [#tpu.dimension_semantics<parallel>], iteration_bounds = array<i64: 2>, scalar_prefetch = 1 : i64, scratch_operands = 0 : i64, tpu.core_type = #tpu.core_type<tc>, window_params = [{pipeline_mode = #tpu.pipeline_mode<synchronous>, transform_indices = @transform_0, window_bounds = array<i64: 2, 32, 32>}, {pipeline_mode = #tpu.pipeline_mode<synchronous>, transform_indices = @transform_1, window_bounds = array<i64: 4, 64, 64>}, {pipeline_mode = #tpu.pipeline_mode<synchronous>, transform_indices = @transform_2, window_bounds = array<i64: 64, 16>}, {pipeline_mode = #tpu.pipeline_mode<synchronous>, transform_indices = @transform_3, window_bounds = array<i64: 4, 16, 16>}, {pipeline_mode = #tpu.pipeline_mode<synchronous>, transform_indices = @transform_4, window_bounds = array<i64: 2, 16, 16>}, {transform_indices = @transform_5, window_bounds = array<i64: 1, 7, 16, 64>}, {transform_indices = @transform_6, window_bounds = array<i64: 1, 2, 16, 16>}]} {
    %c0 = arith.constant 0 : index
    %c0_0 = arith.constant 0 : index
    %c0_1 = arith.constant 0 : index
    %c0_2 = arith.constant 0 : index
    %0 = vector.load %arg7[%c0, %c0_0, %c0_1, %c0_2] : memref<1x7x16x64xf32, #tpu.memory_space<vmem>>, vector<1x1x16x64xf32>
    %1 = vector.shape_cast %0 : vector<1x1x16x64xf32> to vector<16x64xf32>
    %c0_3 = arith.constant 0 : index
    %c1 = arith.constant 1 : index
    %c0_4 = arith.constant 0 : index
    %c0_5 = arith.constant 0 : index
    %2 = vector.load %arg7[%c0_3, %c1, %c0_4, %c0_5] : memref<1x7x16x64xf32, #tpu.memory_space<vmem>>, vector<1x1x16x64xf32>
    %3 = vector.shape_cast %2 : vector<1x1x16x64xf32> to vector<16x64xf32>
    %c0_6 = arith.constant 0 : index
    %c2 = arith.constant 2 : index
    %c0_7 = arith.constant 0 : index
    %c0_8 = arith.constant 0 : index
    %4 = vector.load %arg7[%c0_6, %c2, %c0_7, %c0_8] : memref<1x7x16x64xf32, #tpu.memory_space<vmem>>, vector<1x1x16x64xf32>
    %5 = vector.shape_cast %4 : vector<1x1x16x64xf32> to vector<16x64xf32>
    %c0_9 = arith.constant 0 : index
    %c3 = arith.constant 3 : index
    %c0_10 = arith.constant 0 : index
    %c0_11 = arith.constant 0 : index
    %6 = vector.load %arg7[%c0_9, %c3, %c0_10, %c0_11] : memref<1x7x16x64xf32, #tpu.memory_space<vmem>>, vector<1x1x16x64xf32>
    %7 = vector.shape_cast %6 : vector<1x1x16x64xf32> to vector<16x64xf32>
    %c0_12 = arith.constant 0 : index
    %c4 = arith.constant 4 : index
    %c0_13 = arith.constant 0 : index
    %c0_14 = arith.constant 0 : index
    %8 = vector.load %arg7[%c0_12, %c4, %c0_13, %c0_14] : memref<1x7x16x64xf32, #tpu.memory_space<vmem>>, vector<1x1x16x64xf32>
    %9 = vector.shape_cast %8 : vector<1x1x16x64xf32> to vector<16x64xf32>
    %c0_15 = arith.constant 0 : index
    %c5 = arith.constant 5 : index
    %c0_16 = arith.constant 0 : index
    %c0_17 = arith.constant 0 : index
    %10 = vector.load %arg7[%c0_15, %c5, %c0_16, %c0_17] : memref<1x7x16x64xf32, #tpu.memory_space<vmem>>, vector<1x1x16x64xf32>
    %11 = vector.shape_cast %10 : vector<1x1x16x64xf32> to vector<16x64xf32>
    %c0_18 = arith.constant 0 : index
    %c6 = arith.constant 6 : index
    %c0_19 = arith.constant 0 : index
    %c0_20 = arith.constant 0 : index
    %12 = vector.load %arg7[%c0_18, %c6, %c0_19, %c0_20] : memref<1x7x16x64xf32, #tpu.memory_space<vmem>>, vector<1x1x16x64xf32>
    %13 = vector.shape_cast %12 : vector<1x1x16x64xf32> to vector<16x64xf32>
    %14 = arith.mulf %1, %5 : vector<16x64xf32>
    %15 = arith.mulf %3, %7 : vector<16x64xf32>
    %16 = arith.subf %14, %15 : vector<16x64xf32>
    %17 = arith.mulf %1, %7 : vector<16x64xf32>
    %18 = arith.mulf %3, %5 : vector<16x64xf32>
    %19 = arith.addf %17, %18 : vector<16x64xf32>
    %20 = tpu.concatenate %16, %19 in 0 : vector<16x64xf32>, vector<16x64xf32> -> vector<32x64xf32>
    %21 = arith.truncf %20 : vector<32x64xf32> to vector<32x64xbf16>
    %c0_21 = arith.constant 0 : index
    %c0_22 = arith.constant 0 : index
    %c0_23 = arith.constant 0 : index
    %22 = vector.load %arg2[%c0_21, %c0_22, %c0_23] : memref<2x32x32xbf16, #tpu.memory_space<vmem>>, vector<1x32x32xbf16>
    %23 = vector.shape_cast %22 : vector<1x32x32xbf16> to vector<32x32xbf16>
    %cst = arith.constant dense<0.000000e+00> : vector<32x64xf32>
    %24 = tpu.matmul %23, %21, %cst {dimension_numbers = #tpu.dot_dimension_numbers<[1], [0], [0], [1], [0, 0, 1, 1], [], []>} : vector<32x32xbf16>, vector<32x64xbf16>, vector<32x64xf32> -> vector<32x64xf32>
    %25 = arith.truncf %24 : vector<32x64xf32> to vector<32x64xbf16>
    %c0_24 = arith.constant 0 : index
    %c0_25 = arith.constant 0 : index
    %c0_26 = arith.constant 0 : index
    %26 = vector.load %arg3[%c0_24, %c0_25, %c0_26] : memref<4x64x64xbf16, #tpu.memory_space<vmem>>, vector<1x64x64xbf16>
    %27 = vector.shape_cast %26 : vector<1x64x64xbf16> to vector<64x64xbf16>
    %cst_27 = arith.constant dense<0.000000e+00> : vector<32x64xf32>
    %28 = tpu.matmul %25, %27, %cst_27 {dimension_numbers = #tpu.dot_dimension_numbers<[1], [0], [0], [1], [0, 0, 1, 1], [], []>} : vector<32x64xbf16>, vector<64x64xbf16>, vector<32x64xf32> -> vector<32x64xf32>
    %c1_28 = arith.constant 1 : index
    %c0_29 = arith.constant 0 : index
    %c0_30 = arith.constant 0 : index
    %29 = vector.load %arg3[%c1_28, %c0_29, %c0_30] : memref<4x64x64xbf16, #tpu.memory_space<vmem>>, vector<1x64x64xbf16>
    %30 = vector.shape_cast %29 : vector<1x64x64xbf16> to vector<64x64xbf16>
    %cst_31 = arith.constant dense<0.000000e+00> : vector<32x64xf32>
    %31 = tpu.matmul %25, %30, %cst_31 {dimension_numbers = #tpu.dot_dimension_numbers<[1], [0], [0], [1], [0, 0, 1, 1], [], []>} : vector<32x64xbf16>, vector<64x64xbf16>, vector<32x64xf32> -> vector<32x64xf32>
    %32 = vector.extract_strided_slice %28 {offsets = [0, 0], sizes = [16, 64], strides = [1, 1]} : vector<32x64xf32> to vector<16x64xf32>
    %33 = vector.extract_strided_slice %31 {offsets = [16, 0], sizes = [16, 64], strides = [1, 1]} : vector<32x64xf32> to vector<16x64xf32>
    %34 = arith.subf %32, %33 : vector<16x64xf32>
    %35 = vector.extract_strided_slice %31 {offsets = [0, 0], sizes = [16, 64], strides = [1, 1]} : vector<32x64xf32> to vector<16x64xf32>
    %36 = vector.extract_strided_slice %28 {offsets = [16, 0], sizes = [16, 64], strides = [1, 1]} : vector<32x64xf32> to vector<16x64xf32>
    %37 = arith.addf %35, %36 : vector<16x64xf32>
    %38 = arith.mulf %9, %34 : vector<16x64xf32>
    %39 = arith.subf %38, %11 : vector<16x64xf32>
    %40 = arith.mulf %9, %37 : vector<16x64xf32>
    %41 = arith.subf %40, %13 : vector<16x64xf32>
    %42 = tpu.concatenate %39, %41 in 0 : vector<16x64xf32>, vector<16x64xf32> -> vector<32x64xf32>
    %43 = arith.truncf %42 : vector<32x64xf32> to vector<32x64xbf16>
    %c1_32 = arith.constant 1 : index
    %c0_33 = arith.constant 0 : index
    %c0_34 = arith.constant 0 : index
    %44 = vector.load %arg2[%c1_32, %c0_33, %c0_34] : memref<2x32x32xbf16, #tpu.memory_space<vmem>>, vector<1x32x32xbf16>
    %45 = vector.shape_cast %44 : vector<1x32x32xbf16> to vector<32x32xbf16>
    %cst_35 = arith.constant dense<0.000000e+00> : vector<32x64xf32>
    %46 = tpu.matmul %45, %43, %cst_35 {dimension_numbers = #tpu.dot_dimension_numbers<[1], [0], [0], [1], [0, 0, 1, 1], [], []>} : vector<32x32xbf16>, vector<32x64xbf16>, vector<32x64xf32> -> vector<32x64xf32>
    %47 = arith.truncf %46 : vector<32x64xf32> to vector<32x64xbf16>
    %c2_36 = arith.constant 2 : index
    %c0_37 = arith.constant 0 : index
    %c0_38 = arith.constant 0 : index
    %48 = vector.load %arg3[%c2_36, %c0_37, %c0_38] : memref<4x64x64xbf16, #tpu.memory_space<vmem>>, vector<1x64x64xbf16>
    %49 = vector.shape_cast %48 : vector<1x64x64xbf16> to vector<64x64xbf16>
    %cst_39 = arith.constant dense<0.000000e+00> : vector<32x64xf32>
    %50 = tpu.matmul %47, %49, %cst_39 {dimension_numbers = #tpu.dot_dimension_numbers<[1], [0], [0], [1], [0, 0, 1, 1], [], []>} : vector<32x64xbf16>, vector<64x64xbf16>, vector<32x64xf32> -> vector<32x64xf32>
    %c3_40 = arith.constant 3 : index
    %c0_41 = arith.constant 0 : index
    %c0_42 = arith.constant 0 : index
    %51 = vector.load %arg3[%c3_40, %c0_41, %c0_42] : memref<4x64x64xbf16, #tpu.memory_space<vmem>>, vector<1x64x64xbf16>
    %52 = vector.shape_cast %51 : vector<1x64x64xbf16> to vector<64x64xbf16>
    %cst_43 = arith.constant dense<0.000000e+00> : vector<32x64xf32>
    %53 = tpu.matmul %47, %52, %cst_43 {dimension_numbers = #tpu.dot_dimension_numbers<[1], [0], [0], [1], [0, 0, 1, 1], [], []>} : vector<32x64xbf16>, vector<64x64xbf16>, vector<32x64xf32> -> vector<32x64xf32>
    %54 = vector.extract_strided_slice %50 {offsets = [0, 0], sizes = [16, 64], strides = [1, 1]} : vector<32x64xf32> to vector<16x64xf32>
    %55 = vector.extract_strided_slice %53 {offsets = [16, 0], sizes = [16, 64], strides = [1, 1]} : vector<32x64xf32> to vector<16x64xf32>
    %56 = arith.subf %54, %55 : vector<16x64xf32>
    %57 = vector.extract_strided_slice %53 {offsets = [0, 0], sizes = [16, 64], strides = [1, 1]} : vector<32x64xf32> to vector<16x64xf32>
    %58 = vector.extract_strided_slice %50 {offsets = [16, 0], sizes = [16, 64], strides = [1, 1]} : vector<32x64xf32> to vector<16x64xf32>
    %59 = arith.addf %57, %58 : vector<16x64xf32>
    %60 = arith.mulf %56, %5 : vector<16x64xf32>
    %61 = arith.mulf %59, %7 : vector<16x64xf32>
    %62 = arith.addf %60, %61 : vector<16x64xf32>
    %63 = arith.mulf %59, %5 : vector<16x64xf32>
    %64 = arith.mulf %56, %7 : vector<16x64xf32>
    %65 = arith.subf %63, %64 : vector<16x64xf32>
    %66 = tpu.concatenate %62, %65 in 0 : vector<16x64xf32>, vector<16x64xf32> -> vector<32x64xf32>
    %67 = arith.truncf %66 : vector<32x64xf32> to vector<32x64xbf16>
    %c0_44 = arith.constant 0 : index
    %c0_45 = arith.constant 0 : index
    %68 = vector.load %arg4[%c0_44, %c0_45] : memref<64x16xbf16, #tpu.memory_space<vmem>>, vector<64x16xbf16>
    %cst_46 = arith.constant dense<0.000000e+00> : vector<32x16xf32>
    %69 = tpu.matmul %67, %68, %cst_46 {dimension_numbers = #tpu.dot_dimension_numbers<[1], [0], [0], [1], [0, 0, 1, 1], [], []>} : vector<32x64xbf16>, vector<64x16xbf16>, vector<32x16xf32> -> vector<32x16xf32>
    %70 = vector.extract_strided_slice %69 {offsets = [0, 0], sizes = [16, 16], strides = [1, 1]} : vector<32x16xf32> to vector<16x16xf32>
    %71 = vector.extract_strided_slice %69 {offsets = [16, 0], sizes = [16, 16], strides = [1, 1]} : vector<32x16xf32> to vector<16x16xf32>
    %72 = vector.extract_strided_slice %1 {offsets = [0, 0], sizes = [16, 16], strides = [1, 1]} : vector<16x64xf32> to vector<16x16xf32>
    %73 = vector.extract_strided_slice %3 {offsets = [0, 0], sizes = [16, 16], strides = [1, 1]} : vector<16x64xf32> to vector<16x16xf32>
    %cst_47 = arith.constant 1.500000e+00 : f32
    %74 = vector.broadcast %cst_47 : f32 to vector<16x16xf32>
    %75 = arith.mulf %74, %70 : vector<16x16xf32>
    %76 = arith.subf %72, %75 : vector<16x16xf32>
    %cst_48 = arith.constant 1.500000e+00 : f32
    %77 = vector.broadcast %cst_48 : f32 to vector<16x16xf32>
    %78 = arith.mulf %77, %71 : vector<16x16xf32>
    %79 = arith.subf %73, %78 : vector<16x16xf32>
    %80 = arith.truncf %76 : vector<16x16xf32> to vector<16x16xbf16>
    %81 = arith.truncf %79 : vector<16x16xf32> to vector<16x16xbf16>
    %c0_49 = arith.constant 0 : index
    %c0_50 = arith.constant 0 : index
    %c0_51 = arith.constant 0 : index
    %82 = vector.load %arg6[%c0_49, %c0_50, %c0_51] : memref<2x16x16xf32, #tpu.memory_space<vmem>>, vector<1x16x16xf32>
    %83 = vector.shape_cast %82 : vector<1x16x16xf32> to vector<16x16xf32>
    %c1_52 = arith.constant 1 : index
    %c0_53 = arith.constant 0 : index
    %c0_54 = arith.constant 0 : index
    %84 = vector.load %arg6[%c1_52, %c0_53, %c0_54] : memref<2x16x16xf32, #tpu.memory_space<vmem>>, vector<1x16x16xf32>
    %85 = vector.shape_cast %84 : vector<1x16x16xf32> to vector<16x16xf32>
    %c0_55 = arith.constant 0 : index
    %c0_56 = arith.constant 0 : index
    %c0_57 = arith.constant 0 : index
    %86 = vector.load %arg5[%c0_55, %c0_56, %c0_57] : memref<4x16x16xbf16, #tpu.memory_space<vmem>>, vector<1x16x16xbf16>
    %87 = vector.shape_cast %86 : vector<1x16x16xbf16> to vector<16x16xbf16>
    %cst_58 = arith.constant dense<0.000000e+00> : vector<16x16xf32>
    %88 = tpu.matmul %87, %80, %cst_58 {dimension_numbers = #tpu.dot_dimension_numbers<[1], [0], [0], [1], [0, 0, 1, 1], [], []>} : vector<16x16xbf16>, vector<16x16xbf16>, vector<16x16xf32> -> vector<16x16xf32>
    %cst_59 = arith.constant dense<0.000000e+00> : vector<16x16xf32>
    %89 = tpu.matmul %87, %81, %cst_59 {dimension_numbers = #tpu.dot_dimension_numbers<[1], [0], [0], [1], [0, 0, 1, 1], [], []>} : vector<16x16xbf16>, vector<16x16xbf16>, vector<16x16xf32> -> vector<16x16xf32>
    %90 = tpu.concatenate %88, %89 in 0 : vector<16x16xf32>, vector<16x16xf32> -> vector<32x16xf32>
    %91 = arith.truncf %90 : vector<32x16xf32> to vector<32x16xbf16>
    %c2_60 = arith.constant 2 : index
    %c0_61 = arith.constant 0 : index
    %c0_62 = arith.constant 0 : index
    %92 = vector.load %arg5[%c2_60, %c0_61, %c0_62] : memref<4x16x16xbf16, #tpu.memory_space<vmem>>, vector<1x16x16xbf16>
    %93 = vector.shape_cast %92 : vector<1x16x16xbf16> to vector<16x16xbf16>
    %cst_63 = arith.constant dense<0.000000e+00> : vector<32x16xf32>
    %94 = tpu.matmul %91, %93, %cst_63 {dimension_numbers = #tpu.dot_dimension_numbers<[1], [0], [0], [1], [0, 0, 1, 1], [], []>} : vector<32x16xbf16>, vector<16x16xbf16>, vector<32x16xf32> -> vector<32x16xf32>
    %95 = vector.extract_strided_slice %94 {offsets = [0, 0], sizes = [16, 16], strides = [1, 1]} : vector<32x16xf32> to vector<16x16xf32>
    %96 = vector.extract_strided_slice %94 {offsets = [16, 0], sizes = [16, 16], strides = [1, 1]} : vector<32x16xf32> to vector<16x16xf32>
    %c0_64 = arith.constant 0 : index
    %97 = memref.load %arg1[%c0_64] : memref<54xf32, #tpu.memory_space<smem>>
    %c9 = arith.constant 9 : index
    %98 = memref.load %arg1[%c9] : memref<54xf32, #tpu.memory_space<smem>>
    %c27 = arith.constant 27 : index
    %99 = memref.load %arg1[%c27] : memref<54xf32, #tpu.memory_space<smem>>
    %c36 = arith.constant 36 : index
    %100 = memref.load %arg1[%c36] : memref<54xf32, #tpu.memory_space<smem>>
    %101 = vector.broadcast %97 : f32 to vector<16x16xf32>
    %102 = arith.mulf %101, %95 : vector<16x16xf32>
    %103 = arith.addf %83, %102 : vector<16x16xf32>
    %104 = vector.broadcast %98 : f32 to vector<16x16xf32>
    %105 = arith.mulf %104, %96 : vector<16x16xf32>
    %106 = arith.addf %103, %105 : vector<16x16xf32>
    %107 = vector.broadcast %99 : f32 to vector<16x16xf32>
    %108 = arith.mulf %107, %95 : vector<16x16xf32>
    %109 = arith.addf %85, %108 : vector<16x16xf32>
    %110 = vector.broadcast %100 : f32 to vector<16x16xf32>
    %111 = arith.mulf %110, %96 : vector<16x16xf32>
    %112 = arith.addf %109, %111 : vector<16x16xf32>
    %c1_65 = arith.constant 1 : index
    %113 = memref.load %arg1[%c1_65] : memref<54xf32, #tpu.memory_space<smem>>
    %c10 = arith.constant 10 : index
    %114 = memref.load %arg1[%c10] : memref<54xf32, #tpu.memory_space<smem>>
    %c28 = arith.constant 28 : index
    %115 = memref.load %arg1[%c28] : memref<54xf32, #tpu.memory_space<smem>>
    %c37 = arith.constant 37 : index
    %116 = memref.load %arg1[%c37] : memref<54xf32, #tpu.memory_space<smem>>
    %117 = vector.broadcast %113 : f32 to vector<16x16xf32>
    %118 = arith.mulf %117, %88 : vector<16x16xf32>
    %119 = arith.addf %106, %118 : vector<16x16xf32>
    %120 = vector.broadcast %114 : f32 to vector<16x16xf32>
    %121 = arith.mulf %120, %89 : vector<16x16xf32>
    %122 = arith.addf %119, %121 : vector<16x16xf32>
    %123 = vector.broadcast %115 : f32 to vector<16x16xf32>
    %124 = arith.mulf %123, %88 : vector<16x16xf32>
    %125 = arith.addf %112, %124 : vector<16x16xf32>
    %126 = vector.broadcast %116 : f32 to vector<16x16xf32>
    %127 = arith.mulf %126, %89 : vector<16x16xf32>
    %128 = arith.addf %125, %127 : vector<16x16xf32>
    %c3_66 = arith.constant 3 : index
    %c0_67 = arith.constant 0 : index
    %c0_68 = arith.constant 0 : index
    %129 = vector.load %arg5[%c3_66, %c0_67, %c0_68] : memref<4x16x16xbf16, #tpu.memory_space<vmem>>, vector<1x16x16xbf16>
    %130 = vector.shape_cast %129 : vector<1x16x16xbf16> to vector<16x16xbf16>
    %cst_69 = arith.constant dense<0.000000e+00> : vector<32x16xf32>
    %131 = tpu.matmul %91, %130, %cst_69 {dimension_numbers = #tpu.dot_dimension_numbers<[1], [0], [0], [1], [0, 0, 1, 1], [], []>} : vector<32x16xbf16>, vector<16x16xbf16>, vector<32x16xf32> -> vector<32x16xf32>
    %132 = vector.extract_strided_slice %131 {offsets = [0, 0], sizes = [16, 16], strides = [1, 1]} : vector<32x16xf32> to vector<16x16xf32>
    %133 = vector.extract_strided_slice %131 {offsets = [16, 0], sizes = [16, 16], strides = [1, 1]} : vector<32x16xf32> to vector<16x16xf32>
    %c2_70 = arith.constant 2 : index
    %134 = memref.load %arg1[%c2_70] : memref<54xf32, #tpu.memory_space<smem>>
    %c11 = arith.constant 11 : index
    %135 = memref.load %arg1[%c11] : memref<54xf32, #tpu.memory_space<smem>>
    %c29 = arith.constant 29 : index
    %136 = memref.load %arg1[%c29] : memref<54xf32, #tpu.memory_space<smem>>
    %c38 = arith.constant 38 : index
    %137 = memref.load %arg1[%c38] : memref<54xf32, #tpu.memory_space<smem>>
    %138 = vector.broadcast %134 : f32 to vector<16x16xf32>
    %139 = arith.mulf %138, %132 : vector<16x16xf32>
    %140 = arith.addf %122, %139 : vector<16x16xf32>
    %141 = vector.broadcast %135 : f32 to vector<16x16xf32>
    %142 = arith.mulf %141, %133 : vector<16x16xf32>
    %143 = arith.addf %140, %142 : vector<16x16xf32>
    %144 = vector.broadcast %136 : f32 to vector<16x16xf32>
    %145 = arith.mulf %144, %132 : vector<16x16xf32>
    %146 = arith.addf %128, %145 : vector<16x16xf32>
    %147 = vector.broadcast %137 : f32 to vector<16x16xf32>
    %148 = arith.mulf %147, %133 : vector<16x16xf32>
    %149 = arith.addf %146, %148 : vector<16x16xf32>
    %150 = tpu.concatenate %76, %79 in 0 : vector<16x16xf32>, vector<16x16xf32> -> vector<32x16xf32>
    %151 = arith.truncf %150 : vector<32x16xf32> to vector<32x16xbf16>
    %c2_71 = arith.constant 2 : index
    %c0_72 = arith.constant 0 : index
    %c0_73 = arith.constant 0 : index
    %152 = vector.load %arg5[%c2_71, %c0_72, %c0_73] : memref<4x16x16xbf16, #tpu.memory_space<vmem>>, vector<1x16x16xbf16>
    %153 = vector.shape_cast %152 : vector<1x16x16xbf16> to vector<16x16xbf16>
    %cst_74 = arith.constant dense<0.000000e+00> : vector<32x16xf32>
    %154 = tpu.matmul %151, %153, %cst_74 {dimension_numbers = #tpu.dot_dimension_numbers<[1], [0], [0], [1], [0, 0, 1, 1], [], []>} : vector<32x16xbf16>, vector<16x16xbf16>, vector<32x16xf32> -> vector<32x16xf32>
    %155 = vector.extract_strided_slice %154 {offsets = [0, 0], sizes = [16, 16], strides = [1, 1]} : vector<32x16xf32> to vector<16x16xf32>
    %156 = vector.extract_strided_slice %154 {offsets = [16, 0], sizes = [16, 16], strides = [1, 1]} : vector<32x16xf32> to vector<16x16xf32>
    %c3_75 = arith.constant 3 : index
    %157 = memref.load %arg1[%c3_75] : memref<54xf32, #tpu.memory_space<smem>>
    %c12 = arith.constant 12 : index
    %158 = memref.load %arg1[%c12] : memref<54xf32, #tpu.memory_space<smem>>
    %c30 = arith.constant 30 : index
    %159 = memref.load %arg1[%c30] : memref<54xf32, #tpu.memory_space<smem>>
    %c39 = arith.constant 39 : index
    %160 = memref.load %arg1[%c39] : memref<54xf32, #tpu.memory_space<smem>>
    %161 = vector.broadcast %157 : f32 to vector<16x16xf32>
    %162 = arith.mulf %161, %155 : vector<16x16xf32>
    %163 = arith.addf %143, %162 : vector<16x16xf32>
    %164 = vector.broadcast %158 : f32 to vector<16x16xf32>
    %165 = arith.mulf %164, %156 : vector<16x16xf32>
    %166 = arith.addf %163, %165 : vector<16x16xf32>
    %167 = vector.broadcast %159 : f32 to vector<16x16xf32>
    %168 = arith.mulf %167, %155 : vector<16x16xf32>
    %169 = arith.addf %149, %168 : vector<16x16xf32>
    %170 = vector.broadcast %160 : f32 to vector<16x16xf32>
    %171 = arith.mulf %170, %156 : vector<16x16xf32>
    %172 = arith.addf %169, %171 : vector<16x16xf32>
    %c4_76 = arith.constant 4 : index
    %173 = memref.load %arg1[%c4_76] : memref<54xf32, #tpu.memory_space<smem>>
    %c13 = arith.constant 13 : index
    %174 = memref.load %arg1[%c13] : memref<54xf32, #tpu.memory_space<smem>>
    %c31 = arith.constant 31 : index
    %175 = memref.load %arg1[%c31] : memref<54xf32, #tpu.memory_space<smem>>
    %c40 = arith.constant 40 : index
    %176 = memref.load %arg1[%c40] : memref<54xf32, #tpu.memory_space<smem>>
    %177 = vector.broadcast %173 : f32 to vector<16x16xf32>
    %178 = arith.mulf %177, %76 : vector<16x16xf32>
    %179 = arith.addf %166, %178 : vector<16x16xf32>
    %180 = vector.broadcast %174 : f32 to vector<16x16xf32>
    %181 = arith.mulf %180, %79 : vector<16x16xf32>
    %182 = arith.addf %179, %181 : vector<16x16xf32>
    %183 = vector.broadcast %175 : f32 to vector<16x16xf32>
    %184 = arith.mulf %183, %76 : vector<16x16xf32>
    %185 = arith.addf %172, %184 : vector<16x16xf32>
    %186 = vector.broadcast %176 : f32 to vector<16x16xf32>
    %187 = arith.mulf %186, %79 : vector<16x16xf32>
    %188 = arith.addf %185, %187 : vector<16x16xf32>
    %c3_77 = arith.constant 3 : index
    %c0_78 = arith.constant 0 : index
    %c0_79 = arith.constant 0 : index
    %189 = vector.load %arg5[%c3_77, %c0_78, %c0_79] : memref<4x16x16xbf16, #tpu.memory_space<vmem>>, vector<1x16x16xbf16>
    %190 = vector.shape_cast %189 : vector<1x16x16xbf16> to vector<16x16xbf16>
    %cst_80 = arith.constant dense<0.000000e+00> : vector<32x16xf32>
    %191 = tpu.matmul %151, %190, %cst_80 {dimension_numbers = #tpu.dot_dimension_numbers<[1], [0], [0], [1], [0, 0, 1, 1], [], []>} : vector<32x16xbf16>, vector<16x16xbf16>, vector<32x16xf32> -> vector<32x16xf32>
    %192 = vector.extract_strided_slice %191 {offsets = [0, 0], sizes = [16, 16], strides = [1, 1]} : vector<32x16xf32> to vector<16x16xf32>
    %193 = vector.extract_strided_slice %191 {offsets = [16, 0], sizes = [16, 16], strides = [1, 1]} : vector<32x16xf32> to vector<16x16xf32>
    %c5_81 = arith.constant 5 : index
    %194 = memref.load %arg1[%c5_81] : memref<54xf32, #tpu.memory_space<smem>>
    %c14 = arith.constant 14 : index
    %195 = memref.load %arg1[%c14] : memref<54xf32, #tpu.memory_space<smem>>
    %c32 = arith.constant 32 : index
    %196 = memref.load %arg1[%c32] : memref<54xf32, #tpu.memory_space<smem>>
    %c41 = arith.constant 41 : index
    %197 = memref.load %arg1[%c41] : memref<54xf32, #tpu.memory_space<smem>>
    %198 = vector.broadcast %194 : f32 to vector<16x16xf32>
    %199 = arith.mulf %198, %192 : vector<16x16xf32>
    %200 = arith.addf %182, %199 : vector<16x16xf32>
    %201 = vector.broadcast %195 : f32 to vector<16x16xf32>
    %202 = arith.mulf %201, %193 : vector<16x16xf32>
    %203 = arith.addf %200, %202 : vector<16x16xf32>
    %204 = vector.broadcast %196 : f32 to vector<16x16xf32>
    %205 = arith.mulf %204, %192 : vector<16x16xf32>
    %206 = arith.addf %188, %205 : vector<16x16xf32>
    %207 = vector.broadcast %197 : f32 to vector<16x16xf32>
    %208 = arith.mulf %207, %193 : vector<16x16xf32>
    %209 = arith.addf %206, %208 : vector<16x16xf32>
    %c1_82 = arith.constant 1 : index
    %c0_83 = arith.constant 0 : index
    %c0_84 = arith.constant 0 : index
    %210 = vector.load %arg5[%c1_82, %c0_83, %c0_84] : memref<4x16x16xbf16, #tpu.memory_space<vmem>>, vector<1x16x16xbf16>
    %211 = vector.shape_cast %210 : vector<1x16x16xbf16> to vector<16x16xbf16>
    %cst_85 = arith.constant dense<0.000000e+00> : vector<16x16xf32>
    %212 = tpu.matmul %211, %80, %cst_85 {dimension_numbers = #tpu.dot_dimension_numbers<[1], [0], [0], [1], [0, 0, 1, 1], [], []>} : vector<16x16xbf16>, vector<16x16xbf16>, vector<16x16xf32> -> vector<16x16xf32>
    %cst_86 = arith.constant dense<0.000000e+00> : vector<16x16xf32>
    %213 = tpu.matmul %211, %81, %cst_86 {dimension_numbers = #tpu.dot_dimension_numbers<[1], [0], [0], [1], [0, 0, 1, 1], [], []>} : vector<16x16xbf16>, vector<16x16xbf16>, vector<16x16xf32> -> vector<16x16xf32>
    %214 = tpu.concatenate %212, %213 in 0 : vector<16x16xf32>, vector<16x16xf32> -> vector<32x16xf32>
    %215 = arith.truncf %214 : vector<32x16xf32> to vector<32x16xbf16>
    %c2_87 = arith.constant 2 : index
    %c0_88 = arith.constant 0 : index
    %c0_89 = arith.constant 0 : index
    %216 = vector.load %arg5[%c2_87, %c0_88, %c0_89] : memref<4x16x16xbf16, #tpu.memory_space<vmem>>, vector<1x16x16xbf16>
    %217 = vector.shape_cast %216 : vector<1x16x16xbf16> to vector<16x16xbf16>
    %cst_90 = arith.constant dense<0.000000e+00> : vector<32x16xf32>
    %218 = tpu.matmul %215, %217, %cst_90 {dimension_numbers = #tpu.dot_dimension_numbers<[1], [0], [0], [1], [0, 0, 1, 1], [], []>} : vector<32x16xbf16>, vector<16x16xbf16>, vector<32x16xf32> -> vector<32x16xf32>
    %219 = vector.extract_strided_slice %218 {offsets = [0, 0], sizes = [16, 16], strides = [1, 1]} : vector<32x16xf32> to vector<16x16xf32>
    %220 = vector.extract_strided_slice %218 {offsets = [16, 0], sizes = [16, 16], strides = [1, 1]} : vector<32x16xf32> to vector<16x16xf32>
    %c6_91 = arith.constant 6 : index
    %221 = memref.load %arg1[%c6_91] : memref<54xf32, #tpu.memory_space<smem>>
    %c15 = arith.constant 15 : index
    %222 = memref.load %arg1[%c15] : memref<54xf32, #tpu.memory_space<smem>>
    %c33 = arith.constant 33 : index
    %223 = memref.load %arg1[%c33] : memref<54xf32, #tpu.memory_space<smem>>
    %c42 = arith.constant 42 : index
    %224 = memref.load %arg1[%c42] : memref<54xf32, #tpu.memory_space<smem>>
    %225 = vector.broadcast %221 : f32 to vector<16x16xf32>
    %226 = arith.mulf %225, %219 : vector<16x16xf32>
    %227 = arith.addf %203, %226 : vector<16x16xf32>
    %228 = vector.broadcast %222 : f32 to vector<16x16xf32>
    %229 = arith.mulf %228, %220 : vector<16x16xf32>
    %230 = arith.addf %227, %229 : vector<16x16xf32>
    %231 = vector.broadcast %223 : f32 to vector<16x16xf32>
    %232 = arith.mulf %231, %219 : vector<16x16xf32>
    %233 = arith.addf %209, %232 : vector<16x16xf32>
    %234 = vector.broadcast %224 : f32 to vector<16x16xf32>
    %235 = arith.mulf %234, %220 : vector<16x16xf32>
    %236 = arith.addf %233, %235 : vector<16x16xf32>
    %c7 = arith.constant 7 : index
    %237 = memref.load %arg1[%c7] : memref<54xf32, #tpu.memory_space<smem>>
    %c16 = arith.constant 16 : index
    %238 = memref.load %arg1[%c16] : memref<54xf32, #tpu.memory_space<smem>>
    %c34 = arith.constant 34 : index
    %239 = memref.load %arg1[%c34] : memref<54xf32, #tpu.memory_space<smem>>
    %c43 = arith.constant 43 : index
    %240 = memref.load %arg1[%c43] : memref<54xf32, #tpu.memory_space<smem>>
    %241 = vector.broadcast %237 : f32 to vector<16x16xf32>
    %242 = arith.mulf %241, %212 : vector<16x16xf32>
    %243 = arith.addf %230, %242 : vector<16x16xf32>
    %244 = vector.broadcast %238 : f32 to vector<16x16xf32>
    %245 = arith.mulf %244, %213 : vector<16x16xf32>
    %246 = arith.addf %243, %245 : vector<16x16xf32>
    %247 = vector.broadcast %239 : f32 to vector<16x16xf32>
    %248 = arith.mulf %247, %212 : vector<16x16xf32>
    %249 = arith.addf %236, %248 : vector<16x16xf32>
    %250 = vector.broadcast %240 : f32 to vector<16x16xf32>
    %251 = arith.mulf %250, %213 : vector<16x16xf32>
    %252 = arith.addf %249, %251 : vector<16x16xf32>
    %c3_92 = arith.constant 3 : index
    %c0_93 = arith.constant 0 : index
    %c0_94 = arith.constant 0 : index
    %253 = vector.load %arg5[%c3_92, %c0_93, %c0_94] : memref<4x16x16xbf16, #tpu.memory_space<vmem>>, vector<1x16x16xbf16>
    %254 = vector.shape_cast %253 : vector<1x16x16xbf16> to vector<16x16xbf16>
    %cst_95 = arith.constant dense<0.000000e+00> : vector<32x16xf32>
    %255 = tpu.matmul %215, %254, %cst_95 {dimension_numbers = #tpu.dot_dimension_numbers<[1], [0], [0], [1], [0, 0, 1, 1], [], []>} : vector<32x16xbf16>, vector<16x16xbf16>, vector<32x16xf32> -> vector<32x16xf32>
    %256 = vector.extract_strided_slice %255 {offsets = [0, 0], sizes = [16, 16], strides = [1, 1]} : vector<32x16xf32> to vector<16x16xf32>
    %257 = vector.extract_strided_slice %255 {offsets = [16, 0], sizes = [16, 16], strides = [1, 1]} : vector<32x16xf32> to vector<16x16xf32>
    %c8 = arith.constant 8 : index
    %258 = memref.load %arg1[%c8] : memref<54xf32, #tpu.memory_space<smem>>
    %c17 = arith.constant 17 : index
    %259 = memref.load %arg1[%c17] : memref<54xf32, #tpu.memory_space<smem>>
    %c35 = arith.constant 35 : index
    %260 = memref.load %arg1[%c35] : memref<54xf32, #tpu.memory_space<smem>>
    %c44 = arith.constant 44 : index
    %261 = memref.load %arg1[%c44] : memref<54xf32, #tpu.memory_space<smem>>
    %262 = vector.broadcast %258 : f32 to vector<16x16xf32>
    %263 = arith.mulf %262, %256 : vector<16x16xf32>
    %264 = arith.addf %246, %263 : vector<16x16xf32>
    %265 = vector.broadcast %259 : f32 to vector<16x16xf32>
    %266 = arith.mulf %265, %257 : vector<16x16xf32>
    %267 = arith.addf %264, %266 : vector<16x16xf32>
    %268 = vector.broadcast %260 : f32 to vector<16x16xf32>
    %269 = arith.mulf %268, %256 : vector<16x16xf32>
    %270 = arith.addf %252, %269 : vector<16x16xf32>
    %271 = vector.broadcast %261 : f32 to vector<16x16xf32>
    %272 = arith.mulf %271, %257 : vector<16x16xf32>
    %273 = arith.addf %270, %272 : vector<16x16xf32>
    %cst_96 = arith.constant 5.000000e-02 : f32
    %274 = vector.broadcast %cst_96 : f32 to vector<16x16xf32>
    %275 = arith.mulf %274, %267 : vector<16x16xf32>
    %cst_97 = arith.constant 0.949999988 : f32
    %276 = vector.broadcast %cst_97 : f32 to vector<16x16xf32>
    %277 = arith.mulf %276, %76 : vector<16x16xf32>
    %278 = arith.addf %275, %277 : vector<16x16xf32>
    %c0_98 = arith.constant 0 : index
    %c0_99 = arith.constant 0 : index
    %c0_100 = arith.constant 0 : index
    %c0_101 = arith.constant 0 : index
    %279 = vector.load %arg8[%c0_98, %c0_99, %c0_100, %c0_101] : memref<1x2x16x16xf32, #tpu.memory_space<vmem>>, vector<1x1x16x16xf32>
    %280 = vector.shape_cast %279 : vector<1x1x16x16xf32> to vector<16x16xf32>
    %281 = vector.shape_cast %278 : vector<16x16xf32> to vector<1x1x16x16xf32>
    tpu.vector_store %arg8[%c0_98, %c0_99, %c0_100, %c0_101], %281 {strides = array<i32>} : memref<1x2x16x16xf32, #tpu.memory_space<vmem>>, vector<1x1x16x16xf32>,
    %cst_102 = arith.constant 5.000000e-02 : f32
    %282 = vector.broadcast %cst_102 : f32 to vector<16x16xf32>
    %283 = arith.mulf %282, %273 : vector<16x16xf32>
    %cst_103 = arith.constant 0.949999988 : f32
    %284 = vector.broadcast %cst_103 : f32 to vector<16x16xf32>
    %285 = arith.mulf %284, %79 : vector<16x16xf32>
    %286 = arith.addf %283, %285 : vector<16x16xf32>
    %c0_104 = arith.constant 0 : index
    %c1_105 = arith.constant 1 : index
    %c0_106 = arith.constant 0 : index
    %c0_107 = arith.constant 0 : index
    %287 = vector.load %arg8[%c0_104, %c1_105, %c0_106, %c0_107] : memref<1x2x16x16xf32, #tpu.memory_space<vmem>>, vector<1x1x16x16xf32>
    %288 = vector.shape_cast %287 : vector<1x1x16x16xf32> to vector<16x16xf32>
    %289 = vector.shape_cast %286 : vector<16x16xf32> to vector<1x1x16x16xf32>
    tpu.vector_store %arg8[%c0_104, %c1_105, %c0_106, %c0_107], %289 {strides = array<i32>} : memref<1x2x16x16xf32, #tpu.memory_space<vmem>>, vector<1x1x16x16xf32>,
    return
  }
  func.func @transform_0(%arg0: i32, %arg1: memref<54xf32, #tpu.memory_space<smem>>) -> (i32, i32, i32) {
    %c0_i32 = arith.constant 0 : i32
    %c0_i32_0 = arith.constant 0 : i32
    %c0_i32_1 = arith.constant 0 : i32
    %c0_i32_2 = arith.constant 0 : i32
    return %c0_i32, %c0_i32_0, %c0_i32_1 : i32, i32, i32
  }
  func.func @transform_1(%arg0: i32, %arg1: memref<54xf32, #tpu.memory_space<smem>>) -> (i32, i32, i32) {
    %c0_i32 = arith.constant 0 : i32
    %c0_i32_0 = arith.constant 0 : i32
    %c0_i32_1 = arith.constant 0 : i32
    %c0_i32_2 = arith.constant 0 : i32
    return %c0_i32, %c0_i32_0, %c0_i32_1 : i32, i32, i32
  }
  func.func @transform_2(%arg0: i32, %arg1: memref<54xf32, #tpu.memory_space<smem>>) -> (i32, i32) {
    %c0_i32 = arith.constant 0 : i32
    %c0_i32_0 = arith.constant 0 : i32
    %c0_i32_1 = arith.constant 0 : i32
    return %c0_i32, %c0_i32_0 : i32, i32
  }
  func.func @transform_3(%arg0: i32, %arg1: memref<54xf32, #tpu.memory_space<smem>>) -> (i32, i32, i32) {
    %c0_i32 = arith.constant 0 : i32
    %c0_i32_0 = arith.constant 0 : i32
    %c0_i32_1 = arith.constant 0 : i32
    %c0_i32_2 = arith.constant 0 : i32
    return %c0_i32, %c0_i32_0, %c0_i32_1 : i32, i32, i32
  }
  func.func @transform_4(%arg0: i32, %arg1: memref<54xf32, #tpu.memory_space<smem>>) -> (i32, i32, i32) {
    %c0_i32 = arith.constant 0 : i32
    %c0_i32_0 = arith.constant 0 : i32
    %c0_i32_1 = arith.constant 0 : i32
    %c0_i32_2 = arith.constant 0 : i32
    return %c0_i32, %c0_i32_0, %c0_i32_1 : i32, i32, i32
  }
  func.func @transform_5(%arg0: i32, %arg1: memref<54xf32, #tpu.memory_space<smem>>) -> (i32, i32, i32, i32) {
    %c0_i32 = arith.constant 0 : i32
    %c0_i32_0 = arith.constant 0 : i32
    %c0_i32_1 = arith.constant 0 : i32
    %c0_i32_2 = arith.constant 0 : i32
    return %arg0, %c0_i32, %c0_i32_0, %c0_i32_1 : i32, i32, i32, i32
  }
  func.func @transform_6(%arg0: i32, %arg1: memref<54xf32, #tpu.memory_space<smem>>) -> (i32, i32, i32, i32) {
    %c0_i32 = arith.constant 0 : i32
    %c0_i32_0 = arith.constant 0 : i32
    %c0_i32_1 = arith.constant 0 : i32
    %c0_i32_2 = arith.constant 0 : i32
    return %arg0, %c0_i32, %c0_i32_0, %c0_i32_1 : i32, i32, i32, i32
  }
}

</mosaic_0001>

<bundles_post_ra>
// kernel: tpu_custom_call.1
= control target key start
LH: loop header
LB: loop body
LE: loop exit
PB: predicated region body
PF: predicated region fallthrough
CT: control target
= control target key end

     0   :  { %s3146_s0 = inlined_call_operand.vmem [shape: f32[54], index: 0, kind: input, shape index: {}]   ;;  %s3147_s1 = inlined_call_operand.vmem [shape: bf16[2,32,32], index: 1, kind: input, shape index: {}]   ;;  %s3148_s2 = inlined_call_operand.hbm [shape: bf16[4,64,64], index: 2, kind: input, shape index: {}]   ;;  %s3149_s3 = inlined_call_operand.vmem [shape: bf16[64,16], index: 3, kind: input, shape index: {}]   ;;  %s3150_s4 = inlined_call_operand.hbm [shape: bf16[4,16,16], index: 4, kind: input, shape index: {}]   ;;  %s3151_s5 = inlined_call_operand.hbm [shape: f32[2,16,16], index: 5, kind: input, shape index: {}]   ;;  %s3152_s6 = inlined_call_operand.hbm [shape: f32[2,7,16,64], index: 6, kind: input, shape index: {}]   ;;  %s3153_s7 = inlined_call_operand.hbm [shape: f32[2,2,16,16], index: 7, kind: output, shape index: {}]  }
   0x1   :  { %3159 = sst [smem:[#allocation18_spill]] %s3147_s1  ;;  %s12_s26 = sshll.u32 %s3146_s0, 4  ;;  %s13_s26 = int_to_ptr.vmem [resolvable:$true] %s12_s26 }
   0x2   :  { %s2291_s27 = scalar_lea.vmem %s13_s26, 16  ;;  %p2296_p1 = scmp.lt.s32.totalorder %s13_s26, %s13_s26 }
   0x3   :  { %p2292_p0 = scmp.ne.s32.totalorder %s13_s26, %s2291_s27  ;;  %p2297_p2 = scmp.lt.s32.totalorder %s2291_s27, %s2291_s27 }
   0x5   :  { %p2298_p3 = por %p2297_p2, %p2296_p1 }
   0x7   :  { %p2299_p4 = pnand %p2298_p3, %p2292_p0 }
   0x9   :  { %2302 = shalt.err (!%p2299_p4)  }
   0xa   :  { %s2495_s28 = smov [#allocation3]  }
   0xb   :  { %15 = dma.vmem_to_smem %s13_s26, 16, %s2495_s28, [#allocation2] }
   0xc   :  { %2461 = dma.done.wait [#allocation2], 16 }
   0xd   :  { %2462 = vsyncadd [#allocation2], 4294967280 }
   0xe   :  { %17 = sfence }
   0xf   :  { %18 = vsyncpa [#allocation5], 0 }
  0x10   :  { %19 = vsyncpa [#allocation8], 0 }
  0x11   :  { %20 = vsyncpa [#allocation11], 0 }
  0x12   :  { %22 = vsyncpa [#allocation11 + $0x1], 0 }
  0x13   :  { %23 = vsyncpa [#allocation6], 0 }
  0x14   :  { %25 = vsyncpa [#allocation6 + $0x1], 0  ;;  %s2552_s0 = smov 0   ;;  %s2554_s29 = smov 0  }
  0x15   :  { %s2556_s30 = smov 0   ;;  %s2558_s8 = smov 0  }
  0x16 LB: > { %s2573_s9 = sadd.s32 4294967295, %s2493_s8   ;;  %s1845_s10 = sadd.s32 4294967294, %s2493_s8   ;;  %s2493_s8 = sphi %s2558_s8, %s3182_s8   ;;  %s2489_s30 = sphi %s2556_s30, %s3181_s30   ;;  %s2485_s29 = sphi %s2554_s29, %s3180_s29   ;;  %s2481_s0 = sphi %s2552_s0, %s3179_s0  }
  0x17   : > { %p156_p5 = scmp.ne.s32.totalorder %s2485_s29, %s2481_s0  ;;  %p3154_p6 = scmp.eq.s32.totalorder %s2573_s9, 0 }
  0x18   : > { %p186_p8 = scmp.eq.s32.totalorder %s1845_s10, 1  ;;  %p1846_p10 = scmp.ge.s32.totalorder %s2493_s8, 1 }
  0x19   : > { %p2582_p9 = por %p3154_p6, %p156_p5  ;;  %p193_p12 = scmp.lt.s32.totalorder %s2493_s8, 3 }
  0x1a   : > { %p2587_p11 = por %p186_p8, %p156_p5  ;;  %s2496_s14 = smov [#allocation7]  }
  0x1b   : > { %s3160_s11 = scalar_select %p2582_p9, 1, 0 }
  0x1c   : > { %s3161_s12 = scalar_select %p2587_p11, 1, 0 }
  0x1d   : > { %p2592_p13 = pnand %p1846_p10, %p193_p12  ;;  %s224_s15 = sshll.u32 %s2496_s14, 4  ;;  %s2599_s15 = int_to_ptr.vmem [resolvable:$true] %s224_s15 }
  0x1e   : > { %s2497_s17 = smov [#allocation4]   ;;  %s2498_s19 = smov [#allocation9]  }
  0x1f   : > { %s3162_s13 = scalar_select %p2592_p13, 1, 0 }
  0x20   : > { %p2193_p1 = pneg %p2592_p13  ;;  %s208_s18 = sshll.u32 %s2497_s17, 4  ;;  %s2607_s18 = int_to_ptr.vmem [resolvable:$true] %s208_s18 }
  0x21   : > { %s2609_s20 = sshll.u32 %s2498_s19, 4  ;;  %s2303_s23 = scalar_lea.hbm %s3150_s4, 512  ;;  %s238_s20 = int_to_ptr.vmem [resolvable:$true] %s2609_s20 }
  0x22   : > { %p2603_p2 = pnand %p2193_p1, %p3154_p6  ;;  %p2304_p3 = scmp.ne.s32.totalorder %s3150_s4, %s2303_s23 }
  0x23   : > { %p2310_p10 = scmp.lt.u32.totalorder %s2303_s23, %s3150_s4 }
  0x24   : > { %p2619_p4 = pneg %p2603_p2 }
  0x26   : > { %p2306_p5 = pnand %p2619_p4, %p2304_p3 }
  0x28   : > { %p2307_p8 = pneg %p2306_p5 }
  0x2a   : > { %p2312_p12 = pnand %p2310_p10, %p2307_p8 }
  0x2c   : > { %2315 = shalt.err (!%p2312_p12)
}
  0x2d   : > { %s2316_s10 = scalar_lea.vmem %s2599_s15, 512  ;;  %p2324_p7 = scmp.lt.s32.totalorder %s2599_s15, %s2599_s15 }
  0x2e   : > { %p2317_p1 = scmp.ne.s32.totalorder %s2599_s15, %s2316_s10  ;;  %p2325_p11 = scmp.lt.s32.totalorder %s2316_s10, %s2316_s10 }
  0x30   : > { %p2319_p0 = pnand %p2317_p1, %p2619_p4  ;;  %p2326_p3 = por %p2325_p11, %p2324_p7 }
  0x32   : > { %p2320_p6 = pneg %p2319_p0 }
  0x34   : > { %p2327_p5 = pnand %p2326_p3, %p2320_p6 }
  0x36   : > { %2330 = shalt.err (!%p2327_p5)
}
  0x37   : > { %s2499_s14 = smov 64   ;;  %s2500_s17 = smov 4  }
  0x38   : > { %2199 = dma.hbm_to_vmem [thread:$0]  (!%p2603_p2), %s3150_s4, 512, %s2599_s15, [#allocation8], %s2499_s14, %s2499_s14, %s2500_s17  }
  0x39   : > { %s2331_s24 = scalar_lea.hbm %s3148_s2, 2048 }
  0x3a   : > { %p2332_p7 = scmp.ne.s32.totalorder %s3148_s2, %s2331_s24  ;;  %p2338_p0 = scmp.lt.u32.totalorder %s2331_s24, %s3148_s2 }
  0x3c   : > { %p2334_p6 = pnand %p2332_p7, %p2619_p4 }
  0x3e   : > { %p2335_p11 = pneg %p2334_p6 }
  0x40   : > { %p2340_p8 = pnand %p2338_p0, %p2335_p11 }
  0x42   : > { %2343 = shalt.err (!%p2340_p8)
}
  0x43   : > { %s2344_s15 = scalar_lea.vmem %s2607_s18, 2048  ;;  %p2352_p3 = scmp.lt.s32.totalorder %s2607_s18, %s2607_s18 }
  0x44   : > { %p2345_p10 = scmp.ne.s32.totalorder %s2607_s18, %s2344_s15  ;;  %p2353_p5 = scmp.lt.s32.totalorder %s2344_s15, %s2344_s15 }
  0x46   : > { %p2347_p12 = pnand %p2345_p10, %p2619_p4  ;;  %p2354_p7 = por %p2353_p5, %p2352_p3 }
  0x48   : > { %p2348_p1 = pneg %p2347_p12 }
  0x4a   : > { %p2355_p6 = pnand %p2354_p7, %p2348_p1 }
  0x4c   : > { %2358 = shalt.err (!%p2355_p6)
}
  0x4d   : > { %2196 = dma.hbm_to_vmem [thread:$0]  (!%p2603_p2), %s3148_s2, 2048, %s2607_s18, [#allocation5], %s2499_s14, %s2499_s14, %s2500_s17  }
  0x4e   : > { %s2359_s24 = scalar_lea.hbm %s3151_s5, 512 }
  0x4f   : > { %p2360_p11 = scmp.ne.s32.totalorder %s3151_s5, %s2359_s24  ;;  %p2366_p10 = scmp.lt.u32.totalorder %s2359_s24, %s3151_s5 }
  0x51   : > { %p2362_p0 = pnand %p2360_p11, %p2619_p4 }
  0x53   : > { %p2363_p8 = pneg %p2362_p0 }
  0x55   : > { %p2368_p12 = pnand %p2366_p10, %p2363_p8 }
  0x57   : > { %2371 = shalt.err (!%p2368_p12)
}
  0x58   : > { %s2372_s15 = scalar_lea.vmem %s238_s20, 512  ;;  %p2380_p7 = scmp.lt.s32.totalorder %s238_s20, %s238_s20 }
  0x59   : > { %p2373_p1 = scmp.ne.s32.totalorder %s238_s20, %s2372_s15  ;;  %p2381_p6 = scmp.lt.s32.totalorder %s2372_s15, %s2372_s15 }
  0x5b   : > { %p2375_p3 = pnand %p2373_p1, %p2619_p4  ;;  %p2382_p9 = por %p2381_p6, %p2380_p7 }
  0x5d   : > { %p2376_p5 = pneg %p2375_p3 }
  0x5f   : > { %p2383_p13 = pnand %p2382_p9, %p2376_p5 }
  0x61   : > { %2386 = shalt.err (!%p2383_p13)
}
  0x62   : > { %s3157_s18 = smov 128   ;;  %s3158_s26 = smov 8  }
  0x63   : > { %2202 = dma.hbm_to_vmem [thread:$0]  (!%p2603_p2), %s3151_s5, 512, %s238_s20, [#allocation8], %s3157_s18, %s3157_s18, %s3158_s26  }
  0x64   : > { %s2686_s19 = sadd.s32 1, %s2493_s8   ;;  %s143_s22 = sadd.s32 1, %s2489_s30 }
  0x65   : > { %s140_s21 = ssub.s32 %s2493_s8, %s2686_s19  ;;  %p150_p13 = scmp.ne.s32.totalorder %s2489_s30, %s2485_s29 }
  0x66   : > { %p141_p9 = scmp.eq.s32.totalorder %s140_s21, 0  ;;  %p151_p4 = scmp.eq.s32.totalorder %s2493_s8, 0 }
  0x67   : > { %p2214_p11 = scmp.lt.s32.totalorder %s2493_s8, 2  ;;  %p3165_p8 = scmp.eq.s32.totalorder %s2573_s9, 1 }
  0x68   : > { %s2696_s23 = scalar_select %p141_p9, %s2489_s30, %s143_s22  }
  0x69   : > { %p152_p0 = por %p151_p4, %p150_p13  ;;  %p2700_p10 = por %p3165_p8, %p150_p13 }
  0x6a   : > { %s251_s24 = sand.u32 1, %s2489_s30   ;;  %s2175_s25 = smul.u32 1792, %s2493_s8 }
  0x6b   : > { %s2174_s20 = smul.u32 112, %s251_s24  ;;  %p2706_p2 = pnand %p2214_p11, %p152_p0 }
  0x6c   : > { %s2713_s15 = scalar_lea.hbm %s3152_s6, %s2175_s25  ;;  %s2717_s21 = scalar_lea.sflag [#allocation11], %s251_s24 }
  0x6d   : > { %s255_s14 = scalar_lea.vmem [#allocation10], %s2174_s20  ;;  %s2387_s22 = scalar_lea.hbm %s2713_s15, 1792 }
  0x6e   : > { %s262_s17 = sshll.u32 %s255_s14, 4  ;;  %p2388_p12 = scmp.ne.s32.totalorder %s2713_s15, %s2387_s22  ;;  %s2715_s17 = int_to_ptr.vmem [resolvable:$true] %s262_s17 }
  0x6f   : > { %p2389_p1 = pneg %p2706_p2  ;;  %s2392_s10 = scalar_lea.hbm %s3152_s6, 3584 }
  0x70   : > { %p2393_p7 = scmp.lt.u32.totalorder %s2713_s15, %s3152_s6  ;;  %p2394_p6 = scmp.lt.u32.totalorder %s2392_s10, %s2387_s22 }
  0x71   : > { %p2390_p3 = pnand %p2389_p1, %p2388_p12  ;;  %p2396_p13 = scmp.lt.u32.totalorder %s2387_s22, %s2713_s15 }
  0x72   : > { %p2395_p9 = por %p2394_p6, %p2393_p7 }
  0x73   : > { %p2391_p5 = pneg %p2390_p3 }
  0x74   : > { %p2397_p4 = por %p2396_p13, %p2395_p9 }
  0x76   : > { %p2398_p11 = pnand %p2397_p4, %p2391_p5 }
  0x78   : > { %2401 = shalt.err (!%p2398_p11)
}
  0x79   : > { %s2402_s24 = scalar_lea.vmem %s2715_s17, 1792  ;;  %s2503_s20 = smov [#allocation10]  }
  0x7a   : > { %p2403_p0 = scmp.ne.s32.totalorder %s2715_s17, %s2402_s24  ;;  %s2407_s14 = sshll.u32 %s2503_s20, 4  ;;  %s2408_s14 = int_to_ptr.vmem [resolvable:$false] %s2407_s14 }
  0x7b   : > { %s2409_s18 = scalar_lea.vmem %s2408_s14, 3584  ;;  %p2410_p3 = scmp.lt.s32.totalorder %s2715_s17, %s2408_s14 }
  0x7c   : > { %p2405_p8 = pnand %p2403_p0, %p2389_p1  ;;  %p2411_p7 = scmp.lt.s32.totalorder %s2409_s18, %s2402_s24 }
  0x7e   : > { %p2406_p12 = pneg %p2405_p8  ;;  %p2412_p6 = por %p2411_p7, %p2410_p3 }
  0x80   : > { %p2413_p9 = pnand %p2412_p6, %p2406_p12 }
  0x82   : > { %2416 = shalt.err (!%p2413_p9)
}
  0x83   : > { %s3168_s26 = smov 8   ;;  %s3169_s22 = smov 128  }
  0x84   : > { %2206 = dma.hbm_to_vmem [thread:$0]  (!%p2706_p2), %s2713_s15, 1792, %s2715_s17, %s2717_s21, %s3169_s22, %s3169_s22, %s3168_s26  }
  0x85   : > { %p3170_p1 = scmp.ne.s32.totalorder %s3162_s13, 0 }
  0x86   : > { %p3171_p5 = scmp.eq.s32.totalorder (!%p3170_p1), %s2573_s9, 0 }
  0x87   : > { %274 = sbr.rel (%p3170_p1) target bundleno = 1989 (0x7c5), region = 44 }
  0x8e   : > { %2464 = dma.done.wait (%p3171_p5), [#allocation5], 2048   ;;  %p3172_p13 = pmov %p3171_p5 }
  0x8f   : > { %p3173_p4 = pmov %p3171_p5 }
  0x90   : > { %2466 = vsyncadd (%p3172_p13), [#allocation5], 4294965248 }
  0x91   : > { %2468 = dma.done.wait (%p3173_p4), [#allocation8], 1024   ;;  %p3174_p11 = pmov %p3173_p4 }
  0x92   : > { %s2759_s27 = sand.u32 1, %s2485_s29   ;;  %p3175_p2 = scmp.ne.s32.totalorder %s3160_s11, 0 }
  0x93   : > { %2470 = vsyncadd (%p3174_p11), [#allocation8], 4294966272  ;;  %s2176_s13 = smul.u32 112, %s2759_s27  ;;  %s289_s15 = scalar_lea.sflag [#allocation11], %s2759_s27 }
  0x95   : > { %s2763_s17 = scalar_lea.vmem [#allocation10], %s2176_s13 }
  0x96   : > { %2472 = dma.done.wait (%p3175_p2), %s289_s15, 1792  }
  0x97   : > { %2474 = vsyncadd (%p3175_p2), %s289_s15, 4294965504  ;;  %v2770_v0 = vld [vmem:[%s2763_s17] sm:$0xff]  ;;  %v2773_v1 = vld [vmem:[%s2763_s17 + $0x8] sm:$0xff]  ;;  %vm370_vm0 = vcmask 261120   ;;  %s3176_s1 = sld [smem:[#allocation18_spill]]  ;;  %vm460_vm1 = vcmask 523264  }
  0x98   : > { %v2776_v2 = vld [vmem:[%s2763_s17 + $0x10] sm:$0xff]  ;;  %v2779_v3 = vld [vmem:[%s2763_s17 + $0x18] sm:$0xff]  ;;  %v2782_v4 = vld [vmem:[%s2763_s17 + $0x20] sm:$0xff]  ;;  %vm2505_vm2 = vmmov 0   ;;  %vm981_vm3 = vcmask 130048   ;;  %s1938_s25 = sld [smem:[#allocation3 + $0xd]] }
  0x99   : > { %v2785_v5 = vld [vmem:[%s2763_s17 + $0x28] sm:$0xff]  ;;  %v2788_v6 = vld [vmem:[%s2763_s17 + $0x30] sm:$0xff]  ;;  %v2791_v7 = vld [vmem:[%s2763_s17 + $0x38] sm:$0xff]  ;;  %v342_v8 = vmul.f32 %v2782_v4, %v2770_v0  ;;  %v350_v10 = vmul.f32 %v2782_v4, %v2776_v2  ;;  %s2905_s28 = sld [smem:[#allocation3 + $0x4]]  ;;  %s2907_s10 = sld [smem:[#allocation3 + $0x28]] }
  0x9a   : > { %v343_v9 = vmul.f32 %v2785_v5, %v2773_v1  ;;  %v351_v11 = vmul.f32 %v2785_v5, %v2779_v3  ;;  %v344_v12 = vmul.f32 %v2788_v6, %v2776_v2  ;;  %v345_v13 = vmul.f32 %v2791_v7, %v2779_v3  ;;  %v2265_v21 = vld [vmem:[#allocation4] sm:$0xff]   ;;  %v2267_v24 = vld [vmem:[#allocation4 + $0x8] sm:$0xff]   ;;  %v2269_v25 = vld [vmem:[#allocation4 + $0x10] sm:$0xff]   ;;  %s2909_s24 = sld [smem:[#allocation3 + $0x1f]]  ;;  %s2911_s20 = sld [smem:[#allocation3 + $0x1]] }
  0x9b   : > { %v348_v14 = vmul.f32 %v2788_v6, %v2770_v0  ;;  %v349_v15 = vmul.f32 %v2791_v7, %v2773_v1  ;;  %2046 = vmatprep.subr.bf16.mxu1 %v2265_v21  ;;  %v2266_v26 = vld [vmem:[#allocation4 + $0x20] sm:$0xff]   ;;  %v2268_v28 = vld [vmem:[#allocation4 + $0x28] sm:$0xff]   ;;  %v2270_v29 = vld [vmem:[#allocation4 + $0x30] sm:$0xff]   ;;  %s2913_s14 = sld [smem:[#allocation3 + $0x1c]]  ;;  %s2915_s18 = sld [smem:[#allocation3 + $0xa]] }
  0x9c   : > { %v346_v17 = vsub.f32 %v342_v8, %v344_v12  ;;  %v347_v18 = vsub.f32 %v343_v9, %v345_v13  ;;  %2047 = vmatpush3.bf16.msra.mxu1 %v2265_v21  ;;  %v2271_v30 = vld [vmem:[#allocation4 + $0x18] sm:$0xff]   ;;  %v2275_v39 = vld [vmem:[#allocation4 + $0x40] sm:$0xff]   ;;  %v2277_v40 = vld [vmem:[#allocation4 + $0x48] sm:$0xff]   ;;  %s2917_s26 = sld [smem:[#allocation3 + $0x25]]  ;;  %s2919_s22 = sld [smem:[#allocation3]] }
  0x9d   : > { %v2263_v16 = vld [vmem:[%s3176_s1] sm:$0xff]   ;;  %v352_v19 = vadd.f32 %v350_v10, %v348_v14  ;;  %v353_v20 = vadd.f32 %v351_v11, %v349_v15  ;;  %2048 = vmatprep.subr.bf16.mxu1 %v2267_v24  ;;  %v2264_v27 = vld [vmem:[%s3176_s1 + $0x8] sm:$0xff]   ;;  %v2272_v31 = vld [vmem:[#allocation4 + $0x38] sm:$0xff]   ;;  %s2921_s13 = sld [smem:[#allocation3 + $0x1b]]  ;;  %s2923_s15 = sld [smem:[#allocation3 + $0x9]] }
  0x9e   : > { %2042 = vmatprep.mubr.msk.bf16.mxu0 %vm370_vm0, %v2263_v16  ;;  %v354_v22 = vpack.c.bf16 %v347_v18, %v346_v17  ;;  %v2273_v38 = vld [vmem:[%s3176_s1 + $0x10] sm:$0xff]   ;;  %v1864_v51 = vld [vmem:[%s2763_s17 + $0x48] sm:$0xff]  ;;  %v1866_v60 = vld [vmem:[%s2763_s17 + $0x58] sm:$0xff]  ;;  %s2930_s11 = sld [smem:[#allocation3 + $0x2]]  ;;  %s2932_s21 = sld [smem:[#allocation3 + $0x1d]] }
  0x9f   : > { %v355_v23 = vpack.c.bf16 %v353_v20, %v352_v19  ;;  %v2279_v41 = vld [vmem:[#allocation4 + $0x50] sm:$0xff]   ;;  %v1868_v61 = vld [vmem:[%s2763_s17 + $0x68] sm:$0xff]  ;;  %v2276_v14 = vld [vmem:[#allocation4 + $0x60] sm:$0xff]  }
  0xa0   : > { %2038 = vmatprep.subr.bf16.mxu0 %v354_v22  ;;  %2049 = vmatpush3.bf16.msra.mxu1 %v2267_v24  ;;  %v1863_v44 = vld [vmem:[%s2763_s17 + $0x40] sm:$0xff]  ;;  %v1865_v54 = vld [vmem:[%s2763_s17 + $0x50] sm:$0xff]  ;;  %v2274_v15 = vld [vmem:[%s3176_s1 + $0x18] sm:$0xff]   ;;  %s2963_s1 = sld [smem:[#allocation3 + $0x27]] }
  0xa1   : > { %2039 = vmatpush3.bf16.msra.mxu0 %v354_v22  ;;  %2050 = vmatprep.subr.bf16.mxu1 %v2269_v25  ;;  %v1867_v59 = vld [vmem:[%s2763_s17 + $0x60] sm:$0xff]  ;;  %v2278_v16 = vld [vmem:[#allocation4 + $0x68] sm:$0xff]   ;;  %v2281_v18 = vld [vmem:[#allocation4 + $0x58] sm:$0xff]   ;;  %s2925_s17 = sld [smem:[#allocation3 + $0x24]] }
  0xa2   : > { %2040 = vmatprep.subr.bf16.mxu0 %v355_v23  ;;  %v2280_v17 = vld [vmem:[#allocation4 + $0x70] sm:$0xff]   ;;  %v2282_v19 = vld [vmem:[#allocation4 + $0x78] sm:$0xff]   ;;  %v2283_v20 = vld [vmem:[%s3149_s3] sm:$0xff]  }
  0xa4   : > { %2051 = vmatpush3.bf16.msra.mxu1 %v2269_v25 }
  0xa5   : > { %2041 = vmatpush3.bf16.msra.mxu0 %v355_v23  ;;  %2052 = vmatprep.subr.bf16.mxu1 %v2271_v30 }
  0xa6   : > { %2058 = vmatprep.subr.bf16.mxu0 %v2266_v26 }
  0xa8   : > { %2043 = vmatmul.mubr.msk.bf16.vlgmr.msra.gmra.mrb[0].mxu0 %vm370_vm0, %v2264_v27  ;;  %2053 = vmatpush3.bf16.msra.mxu1 %v2271_v30  ;;  %v2284_v27 = vld [vmem:[%s3149_s3 + $0x8] sm:$0xff]  }
  0xa9   : > { %2059 = vmatpush3.bf16.msra.mxu0 %v2266_v26 }
  0xaa   : > { %2060 = vmatprep.subr.bf16.mxu0 %v2268_v28 }
  0xad   : > { %2061 = vmatpush3.bf16.msra.mxu0 %v2268_v28  ;;  %v2285_v28 = vld [vmem:[%s3149_s3 + $0x10] sm:$0xff]  }
  0xae   : > { %2062 = vmatprep.subr.bf16.mxu0 %v2270_v29 }
  0xb1   : > { %2063 = vmatpush3.bf16.msra.mxu0 %v2270_v29  ;;  %v2286_v29 = vld [vmem:[%s3149_s3 + $0x18] sm:$0xff]  }
  0xb2   : > { %2064 = vmatprep.subr.bf16.mxu0 %v2272_v31 }
  0xb5   : > { %2065 = vmatpush3.bf16.msra.mxu0 %v2272_v31 }
  0xb6   : > { %2078 = vmatprep.subr.bf16.mxu0 %v2275_v39 }
 0x17b   : > { %v2044_v32 = vpop.f32.mrb[0].mxu0 }
 0x17c   : > { %v411_v33 = vpop.f32.mrb[1].mxu0 }
 0x17d   : > { %v2045_v34 = vpop.f32.mrb[2].mxu0 }
 0x17e   : > { %v427_v35 = vpack.c.bf16 %v2045_v34, %v2044_v32  ;;  %v414_v36 = vpop.f32.mrb[3].mxu0 }
 0x17f   : > { %v426_v37 = vpack.c.bf16 %v414_v36, %v411_v33 }
 0x181   : > { %2054 = vmatprep.mubr.msk.bf16.mxu1 %vm460_vm1, %v426_v37  ;;  %2066 = vmatprep.mubr.msk.bf16.mxu0 %vm460_vm1, %v426_v37 }
 0x182   : > { %2055 = vmatmul.mubr.msk.bf16.vlgmr.msra.gmra.mrb[0].mxu1 %vm460_vm1, %v427_v35  ;;  %2067 = vmatmul.mubr.msk.bf16.vlgmr.msra.gmra.mrb[4].mxu0 %vm460_vm1, %v427_v35 }
 0x183   : > { %2074 = vmatprep.mubr.msk.bf16.mxu1 %vm370_vm0, %v2273_v38  ;;  %2079 = vmatpush3.bf16.msra.mxu0 %v2275_v39 }
 0x184   : > { %2080 = vmatprep.subr.bf16.mxu0 %v2277_v40 }
 0x187   : > { %2081 = vmatpush3.bf16.msra.mxu0 %v2277_v40 }
 0x188   : > { %2082 = vmatprep.subr.bf16.mxu0 %v2279_v41 }
 0x18b   : > { %2083 = vmatpush3.bf16.msra.mxu0 %v2279_v41 }
 0x18c   : > { %2084 = vmatprep.subr.bf16.mxu0 %v2281_v18 }
 0x18f   : > { %2085 = vmatpush3.bf16.msra.mxu0 %v2281_v18 }
 0x190   : > { %2102 = vmatprep.subr.bf16.mxu0 %v2283_v20 }
 0x255   : > { %v2056_v42 = vpop.f32.mrb[0].mxu1  ;;  %v2068_v43 = vpop.f32.mrb[4].mxu0 }
 0x256   : > { %v501_v45 = vpop.f32.mrb[1].mxu1  ;;  %v583_v46 = vpop.f32.mrb[5].mxu0 }
 0x257   : > { %v598_v47 = vsub.f32 %v501_v45, %v2068_v43  ;;  %v600_v48 = vadd.f32 %v2056_v42, %v583_v46  ;;  %v2057_v49 = vpop.f32.mrb[2].mxu1  ;;  %v2069_v50 = vpop.f32.mrb[6].mxu0 }
 0x258   : > { %v504_v52 = vpop.f32.mrb[3].mxu1  ;;  %v586_v53 = vpop.f32.mrb[7].mxu0 }
 0x259   : > { %v602_v55 = vmul.f32 %v1863_v44, %v598_v47  ;;  %v606_v56 = vmul.f32 %v1863_v44, %v600_v48  ;;  %v599_v57 = vsub.f32 %v504_v52, %v2069_v50  ;;  %v601_v58 = vadd.f32 %v2057_v49, %v586_v53 }
 0x25b   : > { %v603_v62 = vmul.f32 %v1864_v51, %v599_v57  ;;  %v607_v63 = vmul.f32 %v1864_v51, %v601_v58  ;;  %v604_v8 = vsub.f32 %v602_v55, %v1865_v54  ;;  %v608_v9 = vsub.f32 %v606_v56, %v1867_v59 }
 0x25d   : > { %v605_v10 = vsub.f32 %v603_v62, %v1866_v60  ;;  %v609_v11 = vsub.f32 %v607_v63, %v1868_v61 }
 0x25f   : > { %v610_v12 = vpack.c.bf16 %v605_v10, %v604_v8  ;;  %v611_v13 = vpack.c.bf16 %v609_v11, %v608_v9  ;;  %v2287_v11 = vld [vmem:[#allocation7] sm:$0xff]  }
 0x261   : > { %2070 = vmatprep.subr.bf16.mxu1 %v610_v12 }
 0x262   : > { %2071 = vmatpush3.bf16.msra.mxu1 %v610_v12 }
 0x263   : > { %2072 = vmatprep.subr.bf16.mxu1 %v611_v13 }
 0x266   : > { %2073 = vmatpush3.bf16.msra.mxu1 %v611_v13 }
 0x267   : > { %2090 = vmatprep.subr.bf16.mxu1 %v2276_v14 }
 0x269   : > { %2075 = vmatmul.mubr.msk.bf16.vlgmr.msra.gmra.mrb[4].mxu1 %vm370_vm0, %v2274_v15 }
 0x26a   : > { %2091 = vmatpush3.bf16.msra.mxu1 %v2276_v14 }
 0x26b   : > { %2092 = vmatprep.subr.bf16.mxu1 %v2278_v16 }
 0x26e   : > { %2093 = vmatpush3.bf16.msra.mxu1 %v2278_v16 }
 0x26f   : > { %2094 = vmatprep.subr.bf16.mxu1 %v2280_v17 }
 0x272   : > { %2095 = vmatpush3.bf16.msra.mxu1 %v2280_v17 }
 0x273   : > { %2096 = vmatprep.subr.bf16.mxu1 %v2282_v19 }
 0x276   : > { %2097 = vmatpush3.bf16.msra.mxu1 %v2282_v19 }
 0x33c   : > { %v2076_v21 = vpop.f32.mrb[4].mxu1 }
 0x33d   : > { %v667_v22 = vpop.f32.mrb[5].mxu1 }
 0x33e   : > { %v2077_v23 = vpop.f32.mrb[6].mxu1 }
 0x33f   : > { %v683_v24 = vpack.c.bf16 %v2077_v23, %v2076_v21  ;;  %v670_v25 = vpop.f32.mrb[7].mxu1  ;;  %v1346_v21 = vstv %s2905_s28  ;;  %v1361_v23 = vstv %s2907_s10  ;;  %s2949_s28 = sld [smem:[#allocation3 + $0x26]] }
 0x340   : > { %v682_v26 = vpack.c.bf16 %v670_v25, %v667_v22  ;;  %v1351_v22 = vstv %s1938_s25  ;;  %s2947_s25 = sld [smem:[#allocation3 + $0xb]]  ;;  %s3043_s10 = sld [smem:[#allocation3 + $0x6]] }
 0x342   : > { %2086 = vmatprep.mubr.msk.bf16.mxu0 %vm460_vm1, %v682_v26  ;;  %2098 = vmatprep.mubr.msk.bf16.mxu1 %vm460_vm1, %v682_v26 }
 0x343   : > { %2087 = vmatmul.mubr.msk.bf16.vlgmr.msra.gmra.mrb[8].mxu0 %vm460_vm1, %v683_v24  ;;  %2099 = vmatmul.mubr.msk.bf16.vlgmr.msra.gmra.mrb[8].mxu1 %vm460_vm1, %v683_v24  ;;  %v1356_v24 = vstv %s2909_s24  ;;  %s2961_s24 = sld [smem:[#allocation3 + $0xc]] }
 0x344   : > { %2103 = vmatpush3.bf16.msra.mxu0 %v2283_v20  ;;  %v2290_v20 = vld [vmem:[#allocation7 + $0x8] sm:$0xff]  }
 0x345   : > { %2104 = vmatprep.subr.bf16.mxu0 %v2284_v27 }
 0x348   : > { %2105 = vmatpush3.bf16.msra.mxu0 %v2284_v27 }
 0x349   : > { %2106 = vmatprep.subr.bf16.mxu0 %v2285_v28 }
 0x34c   : > { %2107 = vmatpush3.bf16.msra.mxu0 %v2285_v28  ;;  %v1161_v28 = vstv %s2911_s20  ;;  %s2979_s20 = sld [smem:[#allocation3 + $0x3]] }
 0x34d   : > { %2108 = vmatprep.subr.bf16.mxu0 %v2286_v29 }
 0x350   : > { %2109 = vmatpush3.bf16.msra.mxu0 %v2286_v29  ;;  %v1171_v29 = vstv %s2913_s14  ;;  %s2981_s14 = sld [smem:[#allocation3 + $0x1e]] }
 0x416   : > { %v2088_v30 = vpop.f32.mrb[8].mxu0  ;;  %v2100_v31 = vpop.f32.mrb[8].mxu1 }
 0x417   : > { %v757_v32 = vpop.f32.mrb[9].mxu0  ;;  %v839_v33 = vpop.f32.mrb[9].mxu1 }
 0x418   : > { %v854_v34 = vsub.f32 %v757_v32, %v2100_v31  ;;  %v856_v35 = vadd.f32 %v2088_v30, %v839_v33  ;;  %v2089_v36 = vpop.f32.mrb[10].mxu0  ;;  %v2101_v37 = vpop.f32.mrb[10].mxu1  ;;  %v1166_v32 = vstv %s2915_s18  ;;  %v1176_v33 = vstv %s2917_s26  ;;  %s2997_s18 = sld [smem:[#allocation3 + $0x5]]  ;;  %s2999_s26 = sld [smem:[#allocation3 + $0x20]] }
 0x419   : > { %v760_v38 = vpop.f32.mrb[11].mxu0  ;;  %v842_v39 = vpop.f32.mrb[11].mxu1 }
 0x41a   : > { %v858_v40 = vmul.f32 %v2782_v4, %v854_v34  ;;  %v866_v41 = vmul.f32 %v2788_v6, %v854_v34  ;;  %v860_v42 = vmul.f32 %v2788_v6, %v856_v35  ;;  %v864_v43 = vmul.f32 %v2782_v4, %v856_v35 }
 0x41b   : > { %v855_v44 = vsub.f32 %v760_v38, %v2101_v37  ;;  %v857_v45 = vadd.f32 %v2089_v36, %v842_v39  ;;  %v2504_v4 = vmov 0.0   ;;  %v1137_v34 = vstv %s2919_s22  ;;  %s3007_s22 = sld [smem:[#allocation3 + $0x29]] }
 0x41c   : > { %v862_v46 = vadd.f32 %v860_v42, %v858_v40  ;;  %v868_v47 = vsub.f32 %v864_v43, %v866_v41  ;;  %2114 = vmatprep.subr.bf16.mxu1 %v2504_v4  ;;  %2116 = vmatprep.mubr.msk.bf16.mxu1 %vm2505_vm2, %v2504_v4  ;;  %v1147_v35 = vstv %s2921_s13  ;;  %v1142_v37 = vstv %s2923_s15  ;;  %v969_v40 = vld [vmem:[#allocation9] sm:$0xff]  ;;  %v972_v41 = vld [vmem:[#allocation9 + $0x10] sm:$0xff]  ;;  %s3045_s13 = sld [smem:[#allocation3 + $0x21]]  ;;  %s3047_s15 = sld [smem:[#allocation3 + $0x7]] }
 0x41d   : > { %v859_v48 = vmul.f32 %v2785_v5, %v855_v44  ;;  %v867_v49 = vmul.f32 %v2791_v7, %v855_v44  ;;  %v861_v50 = vmul.f32 %v2791_v7, %v857_v45  ;;  %v865_v51 = vmul.f32 %v2785_v5, %v857_v45 }
 0x41e   : > { %v1152_v38 = vstv %s2925_s17  ;;  %s3049_s17 = sld [smem:[#allocation3 + $0x22]] }
 0x41f   : > { %v863_v52 = vadd.f32 %v861_v50, %v859_v48  ;;  %v869_v53 = vsub.f32 %v865_v51, %v867_v49 }
 0x421   : > { %v870_v54 = vpack.c.bf16 %v863_v52, %v862_v46  ;;  %v871_v55 = vpack.c.bf16 %v869_v53, %v868_v47 }
 0x423   : > { %2110 = vmatprep.mubr.msk.bf16.mxu0 %vm460_vm1, %v870_v54 }
 0x424   : > { %2111 = vmatmul.mubr.msk.bf16.vlgmr.msra.gmra.mrb[12].mxu0 %vm460_vm1, %v871_v55 }
 0x4f7   : > { %v2112_v6 = vpop.f32.mrb[12].mxu0 }
 0x4f8   : > { %v963_v56 = vmul.f32 1.5, %v2112_v6  ;;  %v944_v57 = vpop.f32.mrb[13].mxu0 }
 0x4f9   : > { %v959_v58 = vmul.f32 1.5, %v944_v57  ;;  %v2113_v7 = vpop.f32.mrb[14].mxu0 }
 0x4fa   : > { %v964_v59 = vmul.f32 1.5, %v2113_v7  ;;  %v947_v5 = vpop.f32.mrb[15].mxu0  ;;  %v2863_v61 = vsub.f32 %v2776_v2, %v963_v56  ;;  %v973_v7 = vld [vmem:[#allocation9 + $0x18] sm:$0xff] }
 0x4fb   : > { %v960_v60 = vmul.f32 1.5, %v947_v5  ;;  %v2869_v63 = vsub.f32 %v2770_v0, %v959_v58  ;;  %v2288_v0 = vld [vmem:[#allocation7 + $0x10] sm:$0xff]   ;;  %v970_v58 = vld [vmem:[#allocation9 + $0x8] sm:$0xff] }
 0x4fc   : > { %v2866_v62 = vsub.f32 %v2779_v3, %v964_v59  ;;  %2126 = vmatprep.subr.bf16.mxu0 %v2288_v0  ;;  %v2938_v26 = vmul.f32 %v1351_v22, %v2863_v61  ;;  %v2943_v27 = vmul.f32 %v1361_v23, %v2863_v61 }
 0x4fd   : > { %v2872_v8 = vsub.f32 %v2773_v1, %v960_v60  ;;  %v2289_v1 = vld [vmem:[#allocation7 + $0x18] sm:$0xff]   ;;  %2127 = vmatpush3.bf16.msra.mxu0 %v2288_v0  ;;  %v2935_v25 = vmul.f32 %v1346_v21, %v2869_v63  ;;  %v2952_v30 = vmul.f32 %v1356_v24, %v2869_v63 }
 0x4fe   : > { %v968_v9 = vpack.c.bf16 %v2866_v62, %v2863_v61  ;;  %2138 = vmatprep.subr.bf16.mxu0 %v2288_v0  ;;  %v2955_v31 = vmul.f32 %v1351_v22, %v2866_v62 }
 0x4ff   : > { %v967_v10 = vpack.c.bf16 %v2872_v8, %v2869_v63  ;;  %v2970_v42 = vmul.f32 %v1346_v21, %v2872_v8  ;;  %v2973_v43 = vmul.f32 %v1356_v24, %v2872_v8 }
 0x501   : > { %2115 = vmatpush3.bf16.msra.mxu1 %v967_v10 }
 0x502   : > { %2120 = vmatprep.subr.bf16.mxu1 %v2504_v4 }
 0x504   : > { %2117 = vmatmul.mubr.msk.bf16.vlgmr.msra.gmra.mrb[12].mxu1 %vm981_vm3, %v2287_v11 }
 0x505   : > { %2121 = vmatpush3.bf16.msra.mxu1 %v968_v9  ;;  %2122 = vmatprep.mubr.msk.bf16.mxu1 %vm2505_vm2, %v2504_v4 }
 0x506   : > { %2132 = vmatprep.subr.bf16.mxu1 %v2289_v1 }
 0x50c   : > { %2123 = vmatmul.mubr.msk.bf16.vlgmr.msra.gmra.mrb[16].mxu1 %vm981_vm3, %v2287_v11 }
 0x50d   : > { %2133 = vmatpush3.bf16.msra.mxu1 %v2289_v1 }
 0x50e   : > { %2144 = vmatprep.subr.bf16.mxu1 %v2289_v1 }
 0x5d7   : > { %v2881_v2 = vpop.f32.mrb[12].mxu1 }
 0x5d8   : > { %v2118_v3 = vpop.f32.mrb[13].mxu1  ;;  %v1162_v44 = vmul.f32 %v1161_v28, %v2881_v2  ;;  %v1172_v45 = vmul.f32 %v1171_v29, %v2881_v2 }
 0x5d9   : > { %v2883_v12 = vpop.f32.mrb[14].mxu1 }
 0x5da   : > { %v1067_v13 = vpack.c.bf16 %v2883_v12, %v2881_v2  ;;  %v2119_v14 = vpop.f32.mrb[15].mxu1  ;;  %v1163_v46 = vmul.f32 %v1161_v28, %v2883_v12  ;;  %v1173_v47 = vmul.f32 %v1171_v29, %v2883_v12 }
 0x5dc   : > { %2128 = vmatprep.mubr.msk.bf16.mxu0 %vm981_vm3, %v1067_v13  ;;  %2134 = vmatprep.mubr.msk.bf16.mxu1 %vm981_vm3, %v1067_v13 }
 0x5df   : > { %v2889_v15 = vpop.f32.mrb[16].mxu1 }
 0x5e0   : > { %v2124_v16 = vpop.f32.mrb[17].mxu1  ;;  %v1167_v50 = vmul.f32 %v1166_v32, %v2889_v15  ;;  %v1177_v51 = vmul.f32 %v1176_v33, %v2889_v15 }
 0x5e1   : > { %v2891_v17 = vpop.f32.mrb[18].mxu1  ;;  %v1248_v16 = vstv %s2947_s25  ;;  %s3055_s25 = sld [smem:[#allocation3 + $0x2b]] }
 0x5e2   : > { %v1068_v18 = vpack.c.bf16 %v2891_v17, %v2889_v15  ;;  %v2125_v19 = vpop.f32.mrb[19].mxu1  ;;  %v1178_v6 = vmul.f32 %v1176_v33, %v2891_v17 }
 0x5e3   : > { %v1337_v19 = vstv %s2963_s1  ;;  %s3005_s1 = sld [smem:[#allocation3 + $0xe]] }
 0x5e4   : > { %2129 = vmatmul.mubr.msk.bf16.vlgmr.msra.gmra.mrb[16].mxu0 %vm981_vm3, %v1068_v18  ;;  %2135 = vmatmul.mubr.msk.bf16.vlgmr.msra.gmra.mrb[20].mxu1 %vm981_vm3, %v1068_v18  ;;  %v1327_v18 = vstv %s2961_s24  ;;  %s3061_s24 = sld [smem:[#allocation3 + $0x8]] }
 0x5e5   : > { %2140 = vmatprep.mubr.msk.bf16.mxu0 %vm981_vm3, %v967_v10  ;;  %2146 = vmatprep.mubr.msk.bf16.mxu1 %vm981_vm3, %v967_v10 }
 0x5e6   : > { %2139 = vmatpush3.bf16.msra.mxu0 %v2288_v0  ;;  %2145 = vmatpush3.bf16.msra.mxu1 %v2289_v1 }
 0x5e7   : > { %2150 = vmatprep.subr.bf16.mxu0 %v2504_v4  ;;  %2156 = vmatprep.subr.bf16.mxu1 %v2504_v4 }
 0x5ec   : > { %2141 = vmatmul.mubr.msk.bf16.vlgmr.msra.gmra.mrb[20].mxu0 %vm981_vm3, %v968_v9  ;;  %2147 = vmatmul.mubr.msk.bf16.vlgmr.msra.gmra.mrb[24].mxu1 %vm981_vm3, %v968_v9 }
 0x5ed   : > { %2151 = vmatpush3.bf16.msra.mxu0 %v967_v10  ;;  %2157 = vmatpush3.bf16.msra.mxu1 %v968_v9 }
 0x5ee   : > { %2152 = vmatprep.mubr.msk.bf16.mxu0 %vm2505_vm2, %v2504_v4  ;;  %2158 = vmatprep.mubr.msk.bf16.mxu1 %vm2505_vm2, %v2504_v4  ;;  %v1168_v4 = vmul.f32 %v1166_v32, %v2891_v17  ;;  %v1258_v17 = vstv %s2949_s28  ;;  %s3057_s28 = sld [smem:[#allocation3 + $0x2a]] }
 0x5ef   : > { %2162 = vmatprep.subr.bf16.mxu0 %v2288_v0  ;;  %2168 = vmatprep.subr.bf16.mxu1 %v2289_v1 }
 0x5f4   : > { %2153 = vmatmul.mubr.msk.bf16.vlgmr.msra.gmra.mrb[24].mxu0 %vm981_vm3, %v2290_v20  ;;  %2159 = vmatmul.mubr.msk.bf16.vlgmr.msra.gmra.mrb[28].mxu1 %vm981_vm3, %v2290_v20 }
 0x5f5   : > { %2163 = vmatpush3.bf16.msra.mxu0 %v2288_v0  ;;  %2169 = vmatpush3.bf16.msra.mxu1 %v2289_v1  ;;  %v1243_v0 = vstv %s2930_s11  ;;  %v1253_v1 = vstv %s2932_s21  ;;  %s3051_s11 = sld [smem:[#allocation3 + $0x10]]  ;;  %s3053_s21 = sld [smem:[#allocation3 + $0xf]] }
 0x6b7   : > { %v2130_v36 = vpop.f32.mrb[16].mxu0  ;;  %v2967_v39 = vpop.f32.mrb[20].mxu1 }
 0x6b8   : > { %v1118_v48 = vpop.f32.mrb[17].mxu0  ;;  %v1224_v49 = vpop.f32.mrb[21].mxu1  ;;  %v1143_v56 = vmul.f32 %v2130_v36, %v1142_v37  ;;  %v1153_v57 = vmul.f32 %v2130_v36, %v1152_v38  ;;  %v1332_v36 = vstv %s2981_s14  ;;  %s3069_s14 = sld [smem:[#allocation3 + $0x11]] }
 0x6b9   : > { %v1138_v52 = vmul.f32 %v1137_v34, %v1118_v48  ;;  %v1148_v53 = vmul.f32 %v1147_v35, %v1118_v48  ;;  %v2131_v54 = vpop.f32.mrb[18].mxu0  ;;  %v2137_v55 = vpop.f32.mrb[22].mxu1  ;;  %v1244_v32 = vmul.f32 %v1243_v0, %v1224_v49  ;;  %v1254_v33 = vmul.f32 %v1253_v1, %v1224_v49 }
 0x6ba   : > { %v1121_v59 = vpop.f32.mrb[19].mxu0  ;;  %v1227_v5 = vpop.f32.mrb[23].mxu1  ;;  %v1144_v2 = vmul.f32 %v2131_v54, %v1142_v37  ;;  %v1154_v3 = vmul.f32 %v2131_v54, %v1152_v38 }
 0x6bb   : > { %v1140_v60 = vadd.f32 %v1138_v52, %v969_v40  ;;  %v1150_v9 = vadd.f32 %v1148_v53, %v972_v41  ;;  %v1139_v10 = vmul.f32 %v1137_v34, %v1121_v59  ;;  %v1149_v11 = vmul.f32 %v1147_v35, %v1121_v59 }
 0x6bc   : > { %v1322_v35 = vstv %s2979_s20  ;;  %v1249_v52 = vmul.f32 %v2967_v39, %v1248_v16  ;;  %v1259_v53 = vmul.f32 %v2967_v39, %v1258_v17  ;;  %v1245_v49 = vmul.f32 %v1243_v0, %v1227_v5  ;;  %s3065_s20 = sld [smem:[#allocation3 + $0x23]] }
 0x6bd   : > { %v1145_v12 = vadd.f32 %v1143_v56, %v1140_v60  ;;  %v1155_v13 = vadd.f32 %v1153_v57, %v1150_v9  ;;  %v1141_v14 = vadd.f32 %v1139_v10, %v970_v58  ;;  %v1151_v15 = vadd.f32 %v1149_v11, %v973_v7 }
 0x6be   : > { %v1255_v54 = vmul.f32 %v1253_v1, %v1227_v5  ;;  %v1260_v7 = vmul.f32 %v2137_v55, %v1258_v17 }
 0x6bf   : > { %v1164_v20 = vadd.f32 %v1162_v44, %v1145_v12  ;;  %v1174_v21 = vadd.f32 %v1172_v45, %v1155_v13  ;;  %v1146_v22 = vadd.f32 %v1144_v2, %v1141_v14  ;;  %v1156_v24 = vadd.f32 %v1154_v3, %v1151_v15  ;;  %v2142_v28 = vpop.f32.mrb[20].mxu0  ;;  %v2993_v29 = vpop.f32.mrb[24].mxu1 }
 0x6c0   : > { %v1303_v34 = vpop.f32.mrb[21].mxu0  ;;  %v1400_v37 = vpop.f32.mrb[25].mxu1  ;;  %v1328_v11 = vmul.f32 %v2142_v28, %v1327_v18  ;;  %v1338_v0 = vmul.f32 %v2142_v28, %v1337_v19  ;;  %v1419_v14 = vstv %s2997_s18  ;;  %v1429_v15 = vstv %s2999_s26  ;;  %s3073_s18 = sld [smem:[#allocation3 + $0x2c]]  ;;  %s1856_s26 = sshll.u32 %s2759_s27, 5 }
 0x6c1   : > { %v1169_v38 = vadd.f32 %v1167_v50, %v1164_v20  ;;  %v1179_v40 = vadd.f32 %v1177_v51, %v1174_v21  ;;  %v1165_v41 = vadd.f32 %v1163_v46, %v1146_v22  ;;  %v1175_v44 = vadd.f32 %v1173_v47, %v1156_v24  ;;  %v2143_v45 = vpop.f32.mrb[22].mxu0  ;;  %v3001_v48 = vpop.f32.mrb[26].mxu1 }
 0x6c2   : > { %v1306_v56 = vpop.f32.mrb[23].mxu0  ;;  %v1403_v57 = vpop.f32.mrb[27].mxu1  ;;  %v1250_v47 = vmul.f32 %v2137_v55, %v1248_v16  ;;  %v1323_v59 = vmul.f32 %v1322_v35, %v1303_v34  ;;  %v1333_v60 = vmul.f32 %v1332_v36, %v1303_v34  ;;  %v1329_v16 = vmul.f32 %v2143_v45, %v1327_v18 }
 0x6c3   : > { %v1246_v58 = vadd.f32 %v1244_v32, %v1169_v38  ;;  %v1256_v50 = vadd.f32 %v1254_v33, %v1179_v40  ;;  %v1170_v51 = vadd.f32 %v1168_v4, %v1165_v41  ;;  %v1180_v46 = vadd.f32 %v1178_v6, %v1175_v44 }
 0x6c4   : > { %v1324_v1 = vmul.f32 %v1322_v35, %v1306_v56  ;;  %v1334_v2 = vmul.f32 %v1332_v36, %v1306_v56  ;;  %v1339_v17 = vmul.f32 %v2143_v45, %v1337_v19  ;;  %v1424_v35 = vstv %s3005_s1  ;;  %s1973_s1 = sshll.u32 %s2573_s9, 9  ;;  %s1728_s9 = scalar_lea.sflag [#allocation6], %s2759_s27 }
 0x6c5   : > { %v1247_v9 = vadd.f32 %v1245_v49, %v1170_v51  ;;  %v1257_v39 = vadd.f32 %v1255_v54, %v1180_v46  ;;  %v1251_v10 = vadd.f32 %v1249_v52, %v1246_v58  ;;  %v1261_v5 = vadd.f32 %v1259_v53, %v1256_v50 }
 0x6c6   : > { %v1434_v36 = vstv %s3007_s22  ;;  %v1420_v53 = vmul.f32 %v1419_v14, %v1400_v37  ;;  %v1430_v49 = vmul.f32 %v1429_v15, %v1400_v37  ;;  %v1363_v54 = vmul.f32 %v1361_v23, %v2866_v62  ;;  %s320_s22 = scalar_lea.vmem [#allocation12], %s1856_s26 }
 0x6c7   : > { %v1325_v3 = vadd.f32 %v1323_v59, %v1251_v10  ;;  %v1335_v12 = vadd.f32 %v1333_v60, %v1261_v5  ;;  %v1252_v13 = vadd.f32 %v1250_v47, %v1247_v9  ;;  %v1262_v4 = vadd.f32 %v1260_v7, %v1257_v39  ;;  %v3009_v6 = vpop.f32.mrb[24].mxu0  ;;  %v3011_v55 = vpop.f32.mrb[28].mxu1 }
 0x6c8   : > { %v2154_v20 = vpop.f32.mrb[25].mxu0  ;;  %v2160_v21 = vpop.f32.mrb[29].mxu1  ;;  %v1435_v37 = vmul.f32 %v2993_v29, %v1434_v36  ;;  %v1421_v51 = vmul.f32 %v1419_v14, %v1403_v57  ;;  %v1431_v23 = vmul.f32 %v1429_v15, %v1403_v57  ;;  %v1627_v57 = vstv %s3049_s17  ;;  %s3097_s17 = scalar_lea.hbm %s3153_s7, %s1973_s1 }
 0x6c9   : > { %v1330_v22 = vadd.f32 %v1328_v11, %v1325_v3  ;;  %v1340_v24 = vadd.f32 %v1338_v0, %v1335_v12  ;;  %v1326_v28 = vadd.f32 %v1324_v1, %v1252_v13  ;;  %v1336_v32 = vadd.f32 %v1334_v2, %v1262_v4  ;;  %v3015_v33 = vpop.f32.mrb[26].mxu0  ;;  %v3017_v34 = vpop.f32.mrb[30].mxu1 }
 0x6ca   : > { %v1532_v38 = vpack.c.bf16 %v3015_v33, %v3009_v6  ;;  %v1533_v18 = vpack.c.bf16 %v3017_v34, %v3011_v55  ;;  %v2155_v19 = vpop.f32.mrb[27].mxu0  ;;  %v2161_v40 = vpop.f32.mrb[31].mxu1  ;;  %v1622_v11 = vstv %s3051_s11  ;;  %v1598_v0 = vstv %s3053_s21  ;;  %s2506_s21 = smov [#allocation12]  }
 0x6cb   : > { %v1349_v41 = vadd.f32 %v2935_v25, %v1330_v22  ;;  %v1359_v44 = vadd.f32 %v2952_v30, %v1340_v24  ;;  %v1331_v45 = vadd.f32 %v1329_v16, %v1326_v28  ;;  %v1341_v52 = vadd.f32 %v1339_v17, %v1336_v32 }
 0x6cc   : > { %2164 = vmatprep.mubr.msk.bf16.mxu0 %vm981_vm3, %v1532_v38  ;;  %2170 = vmatprep.mubr.msk.bf16.mxu1 %vm981_vm3, %v1532_v38  ;;  %v1425_v30 = vmul.f32 %v2993_v29, %v1424_v35  ;;  %v1603_v29 = vstv %s3045_s13  ;;  %v1632_v3 = vstv %s3055_s25  ;;  %v1608_v12 = vstv %s3057_s28  ;;  %s2421_s25 = sshll.u32 %s2506_s21, 4  ;;  %s2422_s25 = int_to_ptr.vmem [resolvable:$false] %s2421_s25 }
 0x6cd   : > { %v1354_v56 = vadd.f32 %v2938_v26, %v1349_v41  ;;  %v1364_v58 = vadd.f32 %v2943_v27, %v1359_v44  ;;  %v1350_v50 = vadd.f32 %v2970_v42, %v1331_v45  ;;  %v1360_v25 = vadd.f32 %v2973_v43, %v1341_v52  ;;  %2165 = vmatmul.mubr.msk.bf16.vlgmr.msra.gmra.mrb[28].mxu0 %vm981_vm3, %v1533_v18  ;;  %s2423_s28 = scalar_lea.vmem %s2422_s25, 1024 }
 0x6ce   : > { %2171 = vmatmul.mubr.msk.bf16.vlgmr.msra.gmra.mrb[32].mxu1 %vm981_vm3, %v1533_v18  ;;  %v1426_v27 = vmul.f32 %v3001_v48, %v1424_v35  ;;  %v1436_v42 = vmul.f32 %v3001_v48, %v1434_v36  ;;  %v1617_v48 = vstv %s3047_s15  ;;  %v1628_v17 = vmul.f32 %v1627_v57, %v3009_v6 }
 0x6cf   : > { %v1422_v46 = vadd.f32 %v1420_v53, %v1354_v56  ;;  %v1432_v47 = vadd.f32 %v1430_v49, %v1364_v58  ;;  %v1355_v26 = vadd.f32 %v2955_v31, %v1350_v50  ;;  %v1365_v7 = vadd.f32 %v1363_v54, %v1360_v25 }
 0x6d0   : > { %v1593_v31 = vstv %s3043_s10  ;;  %v1618_v16 = vmul.f32 %v1617_v48, %v3009_v6  ;;  %v1623_v22 = vmul.f32 %v1622_v11, %v3011_v55  ;;  %v1633_v36 = vmul.f32 %v1632_v3, %v3011_v55  ;;  %s1741_s10 = sshll.u32 %s320_s22, 4  ;;  %s3099_s10 = int_to_ptr.vmem [resolvable:$true] %s1741_s10 }
 0x6d1   : > { %v1427_v43 = vadd.f32 %v1425_v30, %v1422_v46  ;;  %v1437_v59 = vadd.f32 %v1435_v37, %v1432_v47  ;;  %v1423_v60 = vadd.f32 %v1421_v51, %v1355_v26  ;;  %v1433_v9 = vadd.f32 %v1431_v23, %v1365_v7  ;;  %s2417_s11 = scalar_lea.vmem %s3099_s10, 512  ;;  %p2424_p3 = scmp.lt.s32.totalorder %s3099_s10, %s2422_s25 }
 0x6d2   : > { %v1619_v40 = vmul.f32 %v1617_v48, %v3015_v33  ;;  %v1690_v49 = vstv %s3061_s24  ;;  %v1629_v54 = vmul.f32 %v1627_v57, %v3015_v33  ;;  %v1700_v55 = vstv %s3065_s20  ;;  %p2418_p0 = scmp.ne.s32.totalorder %s3099_s10, %s2417_s11  ;;  %p2425_p7 = scmp.lt.s32.totalorder %s2423_s28, %s2417_s11 }
 0x6d3   : > { %v1428_v39 = vadd.f32 %v1426_v27, %v1423_v60  ;;  %v1438_v10 = vadd.f32 %v1436_v42, %v1433_v9  ;;  %v1624_v50 = vmul.f32 %v1622_v11, %v3017_v34  ;;  %v1695_v25 = vstv %s3069_s14 }
 0x6d4   : > { %v1705_v51 = vstv %s3073_s18  ;;  %v1634_v26 = vmul.f32 %v1632_v3, %v3017_v34  ;;  %v1712_v34 = vmul.f32 0.95, %v2869_v63  ;;  %p2419_p8 = pnand %p2418_p0, %p2700_p10  ;;  %p2426_p6 = por %p2425_p7, %p2424_p3 }
 0x6d6   : > { %p2420_p12 = pneg %p2419_p8 }
 0x6d8   : > { %p2427_p9 = pnand %p2426_p6, %p2420_p12 }
 0x7a0   : > { %v2166_v5 = vpop.f32.mrb[28].mxu0 }
 0x7a1   : > { %v2172_v1 = vpop.f32.mrb[32].mxu1  ;;  %v1574_v2 = vpop.f32.mrb[29].mxu0  ;;  %v1599_v24 = vmul.f32 %v2166_v5, %v1598_v0  ;;  %v1609_v38 = vmul.f32 %v2166_v5, %v1608_v12 }
 0x7a2   : > { %v1671_v13 = vpop.f32.mrb[33].mxu1  ;;  %v2167_v4 = vpop.f32.mrb[30].mxu0  ;;  %v1594_v14 = vmul.f32 %v1593_v31, %v1574_v2  ;;  %v1604_v15 = vmul.f32 %v1603_v29, %v1574_v2  ;;  %v1706_v9 = vmul.f32 %v2172_v1, %v1705_v51 }
 0x7a3   : > { %v2173_v20 = vpop.f32.mrb[34].mxu1  ;;  %v1577_v21 = vpop.f32.mrb[31].mxu0  ;;  %v1600_v6 = vmul.f32 %v2167_v4, %v1598_v0  ;;  %v1610_v45 = vmul.f32 %v2167_v4, %v1608_v12  ;;  %v1691_v47 = vmul.f32 %v1690_v49, %v1671_v13  ;;  %v1701_v42 = vmul.f32 %v1700_v55, %v1671_v13 }
 0x7a4   : > { %v1595_v28 = vmul.f32 %v1593_v31, %v1577_v21  ;;  %v1596_v32 = vadd.f32 %v1594_v14, %v1427_v43  ;;  %v1674_v35 = vpop.f32.mrb[35].mxu1  ;;  %v1605_v18 = vmul.f32 %v1603_v29, %v1577_v21  ;;  %v1606_v19 = vadd.f32 %v1604_v15, %v1437_v59 }
 0x7a5   : > { %v1696_v43 = vmul.f32 %v2172_v1, %v1695_v25  ;;  %v1692_v59 = vmul.f32 %v1690_v49, %v1674_v35  ;;  %v1697_v29 = vmul.f32 %v2173_v20, %v1695_v25  ;;  %v1707_v5 = vmul.f32 %v2173_v20, %v1705_v51 }
 0x7a6   : > { %v1597_v41 = vadd.f32 %v1595_v28, %v1428_v39  ;;  %v1601_v44 = vadd.f32 %v1599_v24, %v1596_v32  ;;  %v1607_v52 = vadd.f32 %v1605_v18, %v1438_v10  ;;  %v1611_v53 = vadd.f32 %v1609_v38, %v1606_v19 }
 0x7a7   : > { %v1702_v10 = vmul.f32 %v1700_v55, %v1674_v35  ;;  %v1720_v12 = vmul.f32 0.95, %v2863_v61  ;;  %v1713_v14 = vmul.f32 0.95, %v2872_v8 }
 0x7a8   : > { %v1602_v56 = vadd.f32 %v1600_v6, %v1597_v41  ;;  %v1620_v58 = vadd.f32 %v1618_v16, %v1601_v44  ;;  %v1612_v30 = vadd.f32 %v1610_v45, %v1607_v52  ;;  %v1630_v37 = vadd.f32 %v1628_v17, %v1611_v53 }
 0x7a9   : > { %v1721_v17 = vmul.f32 0.95, %v2866_v62 }
 0x7aa   : > { %v1621_v23 = vadd.f32 %v1619_v40, %v1602_v56  ;;  %v1625_v46 = vadd.f32 %v1623_v22, %v1620_v58  ;;  %v1631_v7 = vadd.f32 %v1629_v54, %v1612_v30  ;;  %v1635_v27 = vadd.f32 %v1633_v36, %v1630_v37 }
 0x7ac   : > { %v1626_v33 = vadd.f32 %v1624_v50, %v1621_v23  ;;  %v1693_v60 = vadd.f32 %v1691_v47, %v1625_v46  ;;  %v1636_v39 = vadd.f32 %v1634_v26, %v1631_v7  ;;  %v1703_v31 = vadd.f32 %v1701_v42, %v1635_v27 }
 0x7ae   : > { %v1694_v48 = vadd.f32 %v1692_v59, %v1626_v33  ;;  %v1698_v57 = vadd.f32 %v1696_v43, %v1693_v60  ;;  %v1704_v11 = vadd.f32 %v1702_v10, %v1636_v39  ;;  %v1708_v0 = vadd.f32 %v1706_v9, %v1703_v31 }
 0x7b0   : > { %v1699_v2 = vadd.f32 %v1697_v29, %v1694_v48  ;;  %v1710_v3 = vmul.f32 0.05, %v1698_v57  ;;  %v1709_v13 = vadd.f32 %v1707_v5, %v1704_v11  ;;  %v1718_v4 = vmul.f32 0.05, %v1708_v0 }
 0x7b2   : > { %v1711_v1 = vmul.f32 0.05, %v1699_v2  ;;  %v1714_v15 = vadd.f32 %v1712_v34, %v1710_v3  ;;  %v1719_v16 = vmul.f32 0.05, %v1709_v13  ;;  %v1722_v20 = vadd.f32 %v1720_v12, %v1718_v4 }
 0x7b4   : > { %v1715_v63 = vadd.f32 %v1713_v14, %v1711_v1  ;;  %1716 = vst.msk [vmem:[%s320_s22] sm:$0xff] %vm981_vm3, %v1714_v15  ;;  %v1723_v61 = vadd.f32 %v1721_v17, %v1719_v16  ;;  %1966 = vst.msk [vmem:[%s320_s22 + $0x10] sm:$0xff] %vm981_vm3, %v1722_v20 }
 0x7b6   : > { %1717 = vst.msk [vmem:[%s320_s22 + $0x8] sm:$0xff] %vm981_vm3, %v1715_v63  ;;  %1967 = vst.msk [vmem:[%s320_s22 + $0x18] sm:$0xff] %vm981_vm3, %v1723_v61 }
 0x7b7   : > { %2430 = shalt.err (!%p2427_p9)
}
 0x7b8   : > { %s2431_s24 = scalar_lea.hbm %s3097_s17, 512  ;;  %s2435_s18 = scalar_lea.hbm %s3153_s7, 1024 }
 0x7b9   : > { %p2432_p1 = scmp.ne.s32.totalorder %s3097_s17, %s2431_s24  ;;  %p2436_p4 = scmp.lt.u32.totalorder %s3097_s17, %s3153_s7 }
 0x7ba   : > { %p2437_p11 = scmp.lt.u32.totalorder %s2435_s18, %s2431_s24  ;;  %p2439_p0 = scmp.lt.u32.totalorder %s2431_s24, %s3097_s17 }
 0x7bb   : > { %p2433_p5 = pnand %p2432_p1, %p2700_p10 }
 0x7bc   : > { %p2438_p2 = por %p2437_p11, %p2436_p4 }
 0x7bd   : > { %p2434_p13 = pneg %p2433_p5 }
 0x7be   : > { %p2440_p8 = por %p2439_p0, %p2438_p2 }
 0x7c0   : > { %p2441_p12 = pnand %p2440_p8, %p2434_p13 }
 0x7c2   : > { %2444 = shalt.err (!%p2441_p12)
}
 0x7c3   : > { %s2507_s22 = smov 128   ;;  %s2508_s13 = smov 8  }
 0x7c4   : > { %2191 = dma.vmem_to_hbm [thread:$0]  (%p2700_p10), %s3099_s10, 512, %s3097_s17, %s1728_s9, %s2507_s22, %s2507_s22, %s2508_s13  }
 0x7c5 PF: > { %s1756_s15 = sand.u32 1, %s2481_s0   ;;  %p3177_p3 = scmp.ne.s32.totalorder %s3161_s12, 0 }
 0x7c6   : > { %p3178_p7 = scmp.ge.s32.totalorder %s2493_s8, 2  ;;  %s1757_s11 = scalar_lea.sflag [#allocation6], %s1756_s15 }
 0x7c8   : > { %p2208_p6 = pnand %p3178_p7, %p3177_p3 }
 0x7ca   : > { %2476 = dma.done.wait (!%p2208_p6), %s1757_s11, 512  }
 0x7cb   : > { %2478 = vsyncadd (!%p2208_p6), %s1757_s11, 4294966784  ;;  %p28_p9 = scmp.ge.s32.totalorder %s2686_s19, 4   ;;  %s3179_s0 = smov %s2485_s29 }
 0x7cc   : > { %s3180_s29 = smov %s2489_s30  ;;  %s3181_s30 = smov %s2696_s23 }
 0x7cd   : > { %s3182_s8 = smov %s2686_s19  ;;  %30 = sbr.rel (!%p28_p9) target bundleno = 22 (0x16), region = 117 }
 0x7d4   :  { %1762 = vsyncpa [#allocation5], 1 }
 0x7d5   :  { %1764 = vsyncpa [#allocation5 + $0x1], 1 }
 0x7d6   :  { %1765 = vsyncpa [#allocation8], 1 }
 0x7d7   :  { %1766 = vsyncpa [#allocation11], 1 }
 0x7d8   :  { %1768 = vsyncpa [#allocation11 + $0x1], 1 }
 0x7d9   :  { %1769 = vsyncpa [#allocation6], 1 }
 0x7da   :  { %1771 = vsyncpa [#allocation6 + $0x1], 1 }

</bundles_post_ra>
